<compile_context>
chip_gen: v7x
topology: tpu7x:2x2x1
jax: 0.10.0
libtpu: 0.0.40
codegen_flags: <defaults>
</compile_context>

<pallas_src>
import math

import jax
import jax.numpy as jnp
from jax.experimental import pallas as pl
from jax.experimental.pallas import tpu as pltpu

_BN_EPS = 1e-5


def _pick_pack(n, cin):
    """Images per grid step: fill the 8-sublane vreg where possible, but keep
    >= 2 grid steps so both v7x TensorCores get work (megacore sharding)."""
    target = max(1, 8 // max(cin, 1))
    for cand in range(target, 0, -1):
        if n % cand == 0 and (n // cand) >= min(2, n):
            return cand
    return 1


def _make_double_conv_kernel(H, W, pack):
    HW = H * W
    w_is_pow2 = (W & (W - 1)) == 0
    log2w = W.bit_length() - 1

    def conv3x3_bn_relu(x, w_ref, b_col, tap_masks):
        """x: (Cin, HW) f32, lane axis = flattened H*W of one NCHW image.
        w_ref: (9, Cout, Cin) VMEM ref (BN-folded, tap-major).
        b_col: (Cout, 1) f32 BN-folded bias.  Returns (Cout, HW) f32."""
        cout = w_ref.shape[1]
        acc = jnp.broadcast_to(b_col, (cout, HW))
        for ky in range(3):
            for kx in range(3):
                tap = ky * 3 + kx
                d = (ky - 1) * W + (kx - 1)          # flattened spatial shift
                # xs[c, p] = x[c, p + d]  (XLU rotate; masks zero the OOB taps)
                xs = x if d == 0 else pltpu.roll(x, shift=(-d) % HW, axis=1)
                m = tap_masks[tap]
                if m is not None:
                    xs = jnp.where(m, xs, 0.0)
                # Channel contraction on the MXU (vector-extended slot).
                acc = acc + jnp.dot(
                    w_ref[tap], xs,
                    preferred_element_type=jnp.float32,
                    precision=jax.lax.Precision.HIGHEST)
        return jnp.maximum(acc, 0.0)

    def kernel(x_ref, w1_ref, b1_ref, w2_ref, b2_ref, o_ref):
        # Positional validity masks in flattened space, computed once per grid
        # step and shared by both convs and all packed images.  Modulo/divide
        # replaced by bit ops when W is a power of two.
        lane = jax.lax.broadcasted_iota(jnp.int32, (1, HW), 1)
        if w_is_pow2:
            col = lane & (W - 1)
            row = lane >> log2w
        else:
            col = lane % W
            row = lane // W
        row_ok = (row >= 1, None, row <= H - 2)      # dy = -1, 0, +1
        col_ok = (col >= 1, None, col <= W - 2)      # dx = -1, 0, +1

        def _and(a, b):
            if a is None:
                return b
            if b is None:
                return a
            return jnp.logical_and(a, b)

        tap_masks = [_and(row_ok[ky], col_ok[kx])
                     for ky in range(3) for kx in range(3)]

        b1 = b1_ref[...]
        b2 = b2_ref[...]
        for p in range(pack):                        # static unroll over packed images
            x = x_ref[p].astype(jnp.float32)         # (Cin, HW)
            h1 = conv3x3_bn_relu(x, w1_ref, b1, tap_masks)
            h2 = conv3x3_bn_relu(h1, w2_ref, b2, tap_masks)
            o_ref[p] = h2.astype(o_ref.dtype)

    return kernel


def _fold_bn(w, b, gamma, beta, mean, var, eps=_BN_EPS):
    """Fold eval-mode BatchNorm into conv weight/bias; layout weight tap-major
    as (9, Cout, Cin) so the kernel reads one (Cout, Cin) tile per tap."""
    cout, cin = w.shape[0], w.shape[1]
    s = gamma / jnp.sqrt(var + eps)                      # (Cout,)
    w_eff = w * s[:, None, None, None]                   # (Cout, Cin, 3, 3)
    b_eff = beta + s * (b - mean)                        # (Cout,)
    # (Cout, Cin, 3, 3) -> (3, 3, Cout, Cin) -> (9, Cout, Cin); tap = ky*3 + kx
    w_taps = jnp.transpose(w_eff, (2, 3, 0, 1)).reshape(9, cout, cin)
    return w_taps.astype(jnp.float32), b_eff.reshape(cout, 1).astype(jnp.float32)


def double_conv_forward(x, params):
    """x: (N, Cin, H, W) NCHW. params = ((w1,b1,g1,be1,m1,v1), (w2,b2,g2,be2,m2,v2))."""
    (w1, b1, g1, be1, m1, v1), (w2, b2, g2, be2, m2, v2) = params
    N, Cin, H, W = x.shape
    C1 = w1.shape[0]
    C2 = w2.shape[0]
    HW = H * W

    w1t, b1c = _fold_bn(w1, b1, g1, be1, m1, v1)
    w2t, b2c = _fold_bn(w2, b2, g2, be2, m2, v2)

    pack = _pick_pack(N, Cin)
    grid = (N // pack,)

    # Pure reshape (NCHW is contiguous over H*W) -> no HBM data movement.
    x2 = x.reshape(N, Cin, HW)

    kernel = _make_double_conv_kernel(H, W, pack)

    itemsize = jnp.dtype(x.dtype).itemsize
    flops = 2 * N * HW * 9 * (Cin * C1 + C1 * C2)
    bytes_accessed = int((N * Cin * HW + N * C2 * HW) * itemsize
                         + (w1t.size + b1c.size + w2t.size + b2c.size) * 4)

    out = pl.pallas_call(
        kernel,
        out_shape=jax.ShapeDtypeStruct((N, C2, HW), x.dtype),
        grid_spec=pltpu.PrefetchScalarGridSpec(
            num_scalar_prefetch=0,
            grid=grid,
            in_specs=[
                pl.BlockSpec((pack, Cin, HW), lambda n: (n, 0, 0)),
                pl.BlockSpec((9, C1, Cin), lambda n: (0, 0, 0)),
                pl.BlockSpec((C1, 1), lambda n: (0, 0)),
                pl.BlockSpec((9, C2, C1), lambda n: (0, 0, 0)),
                pl.BlockSpec((C2, 1), lambda n: (0, 0)),
            ],
            out_specs=pl.BlockSpec((pack, C2, HW), lambda n: (n, 0, 0)),
        ),
        compiler_params=pltpu.CompilerParams(
            dimension_semantics=("parallel",),
        ),
        cost_estimate=pl.CostEstimate(
            flops=flops, transcendentals=0, bytes_accessed=bytes_accessed),
    )(x2, w1t, b1c, w2t, b2c)

    return out.reshape(N, C2, H, W)


def init_double_conv_params(key, in_ch, out_ch, dtype=jnp.float32):
    """Deterministic synthetic params matching nn.Conv2d/BatchNorm2d shapes."""
    ks = jax.random.split(key, 12)

    def conv_init(kw, kb, cin, cout):
        fan_in = cin * 9
        wb = math.sqrt(3.0 / fan_in)
        bb = math.sqrt(1.0 / fan_in)
        w = jax.random.uniform(kw, (cout, cin, 3, 3), dtype, minval=-wb, maxval=wb)
        b = jax.random.uniform(kb, (cout,), dtype, minval=-bb, maxval=bb)
        return w, b

    def bn_init(kg, kb, km, kv, c):
        gamma = jax.random.uniform(kg, (c,), dtype, minval=0.5, maxval=1.5)
        beta = 0.1 * jax.random.normal(kb, (c,), dtype)
        mean = 0.1 * jax.random.normal(km, (c,), dtype)
        var = jax.random.uniform(kv, (c,), dtype, minval=0.5, maxval=1.5)
        return gamma, beta, mean, var

    w1, b1 = conv_init(ks[0], ks[1], in_ch, out_ch)
    g1, be1, m1, v1 = bn_init(ks[2], ks[3], ks[4], ks[5], out_ch)
    w2, b2 = conv_init(ks[6], ks[7], out_ch, out_ch)
    g2, be2, m2, v2 = bn_init(ks[8], ks[9], ks[10], ks[11], out_ch)
    return ((w1, b1, g1, be1, m1, v1), (w2, b2, g2, be2, m2, v2))


def double_conv_reference(x, params, eps=_BN_EPS):
    """Plain-JAX reference: (conv3x3 => eval-BN => ReLU) * 2 in NCHW."""
    def block(x, w, b, gamma, beta, mean, var):
        y = jax.lax.conv_general_dilated(
            x, w, window_strides=(1, 1), padding=((1, 1), (1, 1)),
            dimension_numbers=("NCHW", "OIHW", "NCHW"),
            precision=jax.lax.Precision.HIGHEST)
        y = y + b[None, :, None, None]
        y = (y - mean[None, :, None, None]) / jnp.sqrt(var[None, :, None, None] + eps)
        y = y * gamma[None, :, None, None] + beta[None, :, None, None]
        return jnp.maximum(y, 0.0)

    p1, p2 = params
    return block(block(x, *p1), *p2)


if __name__ == "__main__":
    key = jax.random.PRNGKey(0)
    k_x, k_p = jax.random.split(key)

    N, in_ch, out_ch, H, W = 2, 4, 4, 16, 16
    x = jax.random.normal(k_x, (N, in_ch, H, W), jnp.float32)
    params = init_double_conv_params(k_p, in_ch, out_ch)

    y = double_conv_forward(x, params)
    y = jax.block_until_ready(y)

    ref = double_conv_reference(x, params)
    assert y.shape == (N, out_ch, H, W), y.shape
    max_err = float(jnp.max(jnp.abs(y - ref)))
    assert jnp.allclose(y, ref, atol=1e-4, rtol=1e-4), max_err
    print("KERNEL_OK")
</pallas_src>

<mosaic_0001>
module attributes {stable_mosaic.version = 11 : i64} {
  func.func @kernel(%arg0: i32, %arg1: memref<1x4x256xf32, #tpu.memory_space<vmem>>, %arg2: memref<9x4x4xf32, #tpu.memory_space<vmem>>, %arg3: memref<4x1xf32, #tpu.memory_space<vmem>>, %arg4: memref<9x4x4xf32, #tpu.memory_space<vmem>>, %arg5: memref<4x1xf32, #tpu.memory_space<vmem>>, %arg6: memref<1x4x256xf32, #tpu.memory_space<vmem>>) attributes {dimension_semantics = [#tpu.dimension_semantics<parallel>], iteration_bounds = array<i64: 2>, scalar_prefetch = 0 : i64, scratch_operands = 0 : i64, tpu.core_type = #tpu.core_type<tc>, window_params = [{transform_indices = @transform_0, window_bounds = array<i64: 1, 4, 256>}, {pipeline_mode = #tpu.pipeline_mode<synchronous>, transform_indices = @transform_1, window_bounds = array<i64: 9, 4, 4>}, {pipeline_mode = #tpu.pipeline_mode<synchronous>, transform_indices = @transform_2, window_bounds = array<i64: 4, 1>}, {pipeline_mode = #tpu.pipeline_mode<synchronous>, transform_indices = @transform_3, window_bounds = array<i64: 9, 4, 4>}, {pipeline_mode = #tpu.pipeline_mode<synchronous>, transform_indices = @transform_4, window_bounds = array<i64: 4, 1>}, {transform_indices = @transform_5, window_bounds = array<i64: 1, 4, 256>}]} {
    %0 = tpu.iota {dimensions = array<i32: 1>} : vector<1x256xi32>
    %c15_i32 = arith.constant 15 : i32
    %1 = vector.broadcast %c15_i32 : i32 to vector<1x256xi32>
    %2 = arith.andi %0, %1 : vector<1x256xi32>
    %c4_i32 = arith.constant 4 : i32
    %3 = vector.broadcast %c4_i32 : i32 to vector<1x256xi32>
    %4 = arith.shrsi %0, %3 : vector<1x256xi32>
    %c1_i32 = arith.constant 1 : i32
    %5 = vector.broadcast %c1_i32 : i32 to vector<1x256xi32>
    %6 = arith.cmpi sge, %4, %5 : vector<1x256xi32>
    %c14_i32 = arith.constant 14 : i32
    %7 = vector.broadcast %c14_i32 : i32 to vector<1x256xi32>
    %8 = arith.cmpi sle, %4, %7 : vector<1x256xi32>
    %c1_i32_0 = arith.constant 1 : i32
    %9 = vector.broadcast %c1_i32_0 : i32 to vector<1x256xi32>
    %10 = arith.cmpi sge, %2, %9 : vector<1x256xi32>
    %c14_i32_1 = arith.constant 14 : i32
    %11 = vector.broadcast %c14_i32_1 : i32 to vector<1x256xi32>
    %12 = arith.cmpi sle, %2, %11 : vector<1x256xi32>
    %13 = arith.andi %6, %10 : vector<1x256xi1>
    %14 = arith.andi %6, %12 : vector<1x256xi1>
    %15 = arith.andi %8, %10 : vector<1x256xi1>
    %16 = arith.andi %8, %12 : vector<1x256xi1>
    %c0 = arith.constant 0 : index
    %c0_2 = arith.constant 0 : index
    %17 = vector.load %arg3[%c0, %c0_2] : memref<4x1xf32, #tpu.memory_space<vmem>>, vector<4x1xf32>
    %c0_3 = arith.constant 0 : index
    %c0_4 = arith.constant 0 : index
    %18 = vector.load %arg5[%c0_3, %c0_4] : memref<4x1xf32, #tpu.memory_space<vmem>>, vector<4x1xf32>
    %c0_5 = arith.constant 0 : index
    %c0_6 = arith.constant 0 : index
    %c0_7 = arith.constant 0 : index
    %19 = vector.load %arg1[%c0_5, %c0_6, %c0_7] : memref<1x4x256xf32, #tpu.memory_space<vmem>>, vector<1x4x256xf32>
    %20 = vector.shape_cast %19 : vector<1x4x256xf32> to vector<4x256xf32>
    %21 = vector.shape_cast %17 : vector<4x1xf32> to vector<4x1xf32>
    %22 = vector.broadcast %21 : vector<4x1xf32> to vector<4x256xf32>
    %c17_i32 = arith.constant 17 : i32
    %23 = tpu.dynamic_rotate %20 by %c17_i32 dim 1 : vector<4x256xf32>, i32 -> vector<4x256xf32>
    %cst = arith.constant 0.000000e+00 : f32
    %24 = vector.shape_cast %13 : vector<1x256xi1> to vector<1x256xi1>
    %25 = vector.broadcast %24 : vector<1x256xi1> to vector<4x256xi1>
    %26 = vector.broadcast %cst : f32 to vector<4x256xf32>
    %27 = arith.select %25, %23, %26 : vector<4x256xi1>, vector<4x256xf32>
    %c0_8 = arith.constant 0 : index
    %c0_9 = arith.constant 0 : index
    %c0_10 = arith.constant 0 : index
    %28 = vector.load %arg2[%c0_8, %c0_9, %c0_10] : memref<9x4x4xf32, #tpu.memory_space<vmem>>, vector<1x4x4xf32>
    %29 = vector.shape_cast %28 : vector<1x4x4xf32> to vector<4x4xf32>
    %cst_11 = arith.constant dense<0.000000e+00> : vector<4x256xf32>
    %30 = tpu.matmul %29, %27, %cst_11 {dimension_numbers = #tpu.dot_dimension_numbers<[1], [0], [0], [1], [0, 0, 1, 1], [], []>, precision = #tpu.contract_precision<fp32>} : vector<4x4xf32>, vector<4x256xf32>, vector<4x256xf32> -> vector<4x256xf32>
    %31 = arith.addf %22, %30 : vector<4x256xf32>
    %c16_i32 = arith.constant 16 : i32
    %32 = tpu.dynamic_rotate %20 by %c16_i32 dim 1 : vector<4x256xf32>, i32 -> vector<4x256xf32>
    %cst_12 = arith.constant 0.000000e+00 : f32
    %33 = vector.shape_cast %6 : vector<1x256xi1> to vector<1x256xi1>
    %34 = vector.broadcast %33 : vector<1x256xi1> to vector<4x256xi1>
    %35 = vector.broadcast %cst_12 : f32 to vector<4x256xf32>
    %36 = arith.select %34, %32, %35 : vector<4x256xi1>, vector<4x256xf32>
    %c1 = arith.constant 1 : index
    %c0_13 = arith.constant 0 : index
    %c0_14 = arith.constant 0 : index
    %37 = vector.load %arg2[%c1, %c0_13, %c0_14] : memref<9x4x4xf32, #tpu.memory_space<vmem>>, vector<1x4x4xf32>
    %38 = vector.shape_cast %37 : vector<1x4x4xf32> to vector<4x4xf32>
    %cst_15 = arith.constant dense<0.000000e+00> : vector<4x256xf32>
    %39 = tpu.matmul %38, %36, %cst_15 {dimension_numbers = #tpu.dot_dimension_numbers<[1], [0], [0], [1], [0, 0, 1, 1], [], []>, precision = #tpu.contract_precision<fp32>} : vector<4x4xf32>, vector<4x256xf32>, vector<4x256xf32> -> vector<4x256xf32>
    %40 = arith.addf %31, %39 : vector<4x256xf32>
    %c15_i32_16 = arith.constant 15 : i32
    %41 = tpu.dynamic_rotate %20 by %c15_i32_16 dim 1 : vector<4x256xf32>, i32 -> vector<4x256xf32>
    %cst_17 = arith.constant 0.000000e+00 : f32
    %42 = vector.shape_cast %14 : vector<1x256xi1> to vector<1x256xi1>
    %43 = vector.broadcast %42 : vector<1x256xi1> to vector<4x256xi1>
    %44 = vector.broadcast %cst_17 : f32 to vector<4x256xf32>
    %45 = arith.select %43, %41, %44 : vector<4x256xi1>, vector<4x256xf32>
    %c2 = arith.constant 2 : index
    %c0_18 = arith.constant 0 : index
    %c0_19 = arith.constant 0 : index
    %46 = vector.load %arg2[%c2, %c0_18, %c0_19] : memref<9x4x4xf32, #tpu.memory_space<vmem>>, vector<1x4x4xf32>
    %47 = vector.shape_cast %46 : vector<1x4x4xf32> to vector<4x4xf32>
    %cst_20 = arith.constant dense<0.000000e+00> : vector<4x256xf32>
    %48 = tpu.matmul %47, %45, %cst_20 {dimension_numbers = #tpu.dot_dimension_numbers<[1], [0], [0], [1], [0, 0, 1, 1], [], []>, precision = #tpu.contract_precision<fp32>} : vector<4x4xf32>, vector<4x256xf32>, vector<4x256xf32> -> vector<4x256xf32>
    %49 = arith.addf %40, %48 : vector<4x256xf32>
    %c1_i32_21 = arith.constant 1 : i32
    %50 = tpu.dynamic_rotate %20 by %c1_i32_21 dim 1 : vector<4x256xf32>, i32 -> vector<4x256xf32>
    %cst_22 = arith.constant 0.000000e+00 : f32
    %51 = vector.shape_cast %10 : vector<1x256xi1> to vector<1x256xi1>
    %52 = vector.broadcast %51 : vector<1x256xi1> to vector<4x256xi1>
    %53 = vector.broadcast %cst_22 : f32 to vector<4x256xf32>
    %54 = arith.select %52, %50, %53 : vector<4x256xi1>, vector<4x256xf32>
    %c3 = arith.constant 3 : index
    %c0_23 = arith.constant 0 : index
    %c0_24 = arith.constant 0 : index
    %55 = vector.load %arg2[%c3, %c0_23, %c0_24] : memref<9x4x4xf32, #tpu.memory_space<vmem>>, vector<1x4x4xf32>
    %56 = vector.shape_cast %55 : vector<1x4x4xf32> to vector<4x4xf32>
    %cst_25 = arith.constant dense<0.000000e+00> : vector<4x256xf32>
    %57 = tpu.matmul %56, %54, %cst_25 {dimension_numbers = #tpu.dot_dimension_numbers<[1], [0], [0], [1], [0, 0, 1, 1], [], []>, precision = #tpu.contract_precision<fp32>} : vector<4x4xf32>, vector<4x256xf32>, vector<4x256xf32> -> vector<4x256xf32>
    %58 = arith.addf %49, %57 : vector<4x256xf32>
    %c4 = arith.constant 4 : index
    %c0_26 = arith.constant 0 : index
    %c0_27 = arith.constant 0 : index
    %59 = vector.load %arg2[%c4, %c0_26, %c0_27] : memref<9x4x4xf32, #tpu.memory_space<vmem>>, vector<1x4x4xf32>
    %60 = vector.shape_cast %59 : vector<1x4x4xf32> to vector<4x4xf32>
    %cst_28 = arith.constant dense<0.000000e+00> : vector<4x256xf32>
    %61 = tpu.matmul %60, %20, %cst_28 {dimension_numbers = #tpu.dot_dimension_numbers<[1], [0], [0], [1], [0, 0, 1, 1], [], []>, precision = #tpu.contract_precision<fp32>} : vector<4x4xf32>, vector<4x256xf32>, vector<4x256xf32> -> vector<4x256xf32>
    %62 = arith.addf %58, %61 : vector<4x256xf32>
    %c255_i32 = arith.constant 255 : i32
    %63 = tpu.dynamic_rotate %20 by %c255_i32 dim 1 : vector<4x256xf32>, i32 -> vector<4x256xf32>
    %cst_29 = arith.constant 0.000000e+00 : f32
    %64 = vector.shape_cast %12 : vector<1x256xi1> to vector<1x256xi1>
    %65 = vector.broadcast %64 : vector<1x256xi1> to vector<4x256xi1>
    %66 = vector.broadcast %cst_29 : f32 to vector<4x256xf32>
    %67 = arith.select %65, %63, %66 : vector<4x256xi1>, vector<4x256xf32>
    %c5 = arith.constant 5 : index
    %c0_30 = arith.constant 0 : index
    %c0_31 = arith.constant 0 : index
    %68 = vector.load %arg2[%c5, %c0_30, %c0_31] : memref<9x4x4xf32, #tpu.memory_space<vmem>>, vector<1x4x4xf32>
    %69 = vector.shape_cast %68 : vector<1x4x4xf32> to vector<4x4xf32>
    %cst_32 = arith.constant dense<0.000000e+00> : vector<4x256xf32>
    %70 = tpu.matmul %69, %67, %cst_32 {dimension_numbers = #tpu.dot_dimension_numbers<[1], [0], [0], [1], [0, 0, 1, 1], [], []>, precision = #tpu.contract_precision<fp32>} : vector<4x4xf32>, vector<4x256xf32>, vector<4x256xf32> -> vector<4x256xf32>
    %71 = arith.addf %62, %70 : vector<4x256xf32>
    %c241_i32 = arith.constant 241 : i32
    %72 = tpu.dynamic_rotate %20 by %c241_i32 dim 1 : vector<4x256xf32>, i32 -> vector<4x256xf32>
    %cst_33 = arith.constant 0.000000e+00 : f32
    %73 = vector.shape_cast %15 : vector<1x256xi1> to vector<1x256xi1>
    %74 = vector.broadcast %73 : vector<1x256xi1> to vector<4x256xi1>
    %75 = vector.broadcast %cst_33 : f32 to vector<4x256xf32>
    %76 = arith.select %74, %72, %75 : vector<4x256xi1>, vector<4x256xf32>
    %c6 = arith.constant 6 : index
    %c0_34 = arith.constant 0 : index
    %c0_35 = arith.constant 0 : index
    %77 = vector.load %arg2[%c6, %c0_34, %c0_35] : memref<9x4x4xf32, #tpu.memory_space<vmem>>, vector<1x4x4xf32>
    %78 = vector.shape_cast %77 : vector<1x4x4xf32> to vector<4x4xf32>
    %cst_36 = arith.constant dense<0.000000e+00> : vector<4x256xf32>
    %79 = tpu.matmul %78, %76, %cst_36 {dimension_numbers = #tpu.dot_dimension_numbers<[1], [0], [0], [1], [0, 0, 1, 1], [], []>, precision = #tpu.contract_precision<fp32>} : vector<4x4xf32>, vector<4x256xf32>, vector<4x256xf32> -> vector<4x256xf32>
    %80 = arith.addf %71, %79 : vector<4x256xf32>
    %c240_i32 = arith.constant 240 : i32
    %81 = tpu.dynamic_rotate %20 by %c240_i32 dim 1 : vector<4x256xf32>, i32 -> vector<4x256xf32>
    %cst_37 = arith.constant 0.000000e+00 : f32
    %82 = vector.shape_cast %8 : vector<1x256xi1> to vector<1x256xi1>
    %83 = vector.broadcast %82 : vector<1x256xi1> to vector<4x256xi1>
    %84 = vector.broadcast %cst_37 : f32 to vector<4x256xf32>
    %85 = arith.select %83, %81, %84 : vector<4x256xi1>, vector<4x256xf32>
    %c7 = arith.constant 7 : index
    %c0_38 = arith.constant 0 : index
    %c0_39 = arith.constant 0 : index
    %86 = vector.load %arg2[%c7, %c0_38, %c0_39] : memref<9x4x4xf32, #tpu.memory_space<vmem>>, vector<1x4x4xf32>
    %87 = vector.shape_cast %86 : vector<1x4x4xf32> to vector<4x4xf32>
    %cst_40 = arith.constant dense<0.000000e+00> : vector<4x256xf32>
    %88 = tpu.matmul %87, %85, %cst_40 {dimension_numbers = #tpu.dot_dimension_numbers<[1], [0], [0], [1], [0, 0, 1, 1], [], []>, precision = #tpu.contract_precision<fp32>} : vector<4x4xf32>, vector<4x256xf32>, vector<4x256xf32> -> vector<4x256xf32>
    %89 = arith.addf %80, %88 : vector<4x256xf32>
    %c239_i32 = arith.constant 239 : i32
    %90 = tpu.dynamic_rotate %20 by %c239_i32 dim 1 : vector<4x256xf32>, i32 -> vector<4x256xf32>
    %cst_41 = arith.constant 0.000000e+00 : f32
    %91 = vector.shape_cast %16 : vector<1x256xi1> to vector<1x256xi1>
    %92 = vector.broadcast %91 : vector<1x256xi1> to vector<4x256xi1>
    %93 = vector.broadcast %cst_41 : f32 to vector<4x256xf32>
    %94 = arith.select %92, %90, %93 : vector<4x256xi1>, vector<4x256xf32>
    %c8 = arith.constant 8 : index
    %c0_42 = arith.constant 0 : index
    %c0_43 = arith.constant 0 : index
    %95 = vector.load %arg2[%c8, %c0_42, %c0_43] : memref<9x4x4xf32, #tpu.memory_space<vmem>>, vector<1x4x4xf32>
    %96 = vector.shape_cast %95 : vector<1x4x4xf32> to vector<4x4xf32>
    %cst_44 = arith.constant dense<0.000000e+00> : vector<4x256xf32>
    %97 = tpu.matmul %96, %94, %cst_44 {dimension_numbers = #tpu.dot_dimension_numbers<[1], [0], [0], [1], [0, 0, 1, 1], [], []>, precision = #tpu.contract_precision<fp32>} : vector<4x4xf32>, vector<4x256xf32>, vector<4x256xf32> -> vector<4x256xf32>
    %98 = arith.addf %89, %97 : vector<4x256xf32>
    %cst_45 = arith.constant 0.000000e+00 : f32
    %99 = vector.broadcast %cst_45 : f32 to vector<4x256xf32>
    %100 = arith.maximumf %98, %99 : vector<4x256xf32>
    %101 = vector.shape_cast %18 : vector<4x1xf32> to vector<4x1xf32>
    %102 = vector.broadcast %101 : vector<4x1xf32> to vector<4x256xf32>
    %c17_i32_46 = arith.constant 17 : i32
    %103 = tpu.dynamic_rotate %100 by %c17_i32_46 dim 1 : vector<4x256xf32>, i32 -> vector<4x256xf32>
    %cst_47 = arith.constant 0.000000e+00 : f32
    %104 = vector.shape_cast %13 : vector<1x256xi1> to vector<1x256xi1>
    %105 = vector.broadcast %104 : vector<1x256xi1> to vector<4x256xi1>
    %106 = vector.broadcast %cst_47 : f32 to vector<4x256xf32>
    %107 = arith.select %105, %103, %106 : vector<4x256xi1>, vector<4x256xf32>
    %c0_48 = arith.constant 0 : index
    %c0_49 = arith.constant 0 : index
    %c0_50 = arith.constant 0 : index
    %108 = vector.load %arg4[%c0_48, %c0_49, %c0_50] : memref<9x4x4xf32, #tpu.memory_space<vmem>>, vector<1x4x4xf32>
    %109 = vector.shape_cast %108 : vector<1x4x4xf32> to vector<4x4xf32>
    %cst_51 = arith.constant dense<0.000000e+00> : vector<4x256xf32>
    %110 = tpu.matmul %109, %107, %cst_51 {dimension_numbers = #tpu.dot_dimension_numbers<[1], [0], [0], [1], [0, 0, 1, 1], [], []>, precision = #tpu.contract_precision<fp32>} : vector<4x4xf32>, vector<4x256xf32>, vector<4x256xf32> -> vector<4x256xf32>
    %111 = arith.addf %102, %110 : vector<4x256xf32>
    %c16_i32_52 = arith.constant 16 : i32
    %112 = tpu.dynamic_rotate %100 by %c16_i32_52 dim 1 : vector<4x256xf32>, i32 -> vector<4x256xf32>
    %cst_53 = arith.constant 0.000000e+00 : f32
    %113 = vector.shape_cast %6 : vector<1x256xi1> to vector<1x256xi1>
    %114 = vector.broadcast %113 : vector<1x256xi1> to vector<4x256xi1>
    %115 = vector.broadcast %cst_53 : f32 to vector<4x256xf32>
    %116 = arith.select %114, %112, %115 : vector<4x256xi1>, vector<4x256xf32>
    %c1_54 = arith.constant 1 : index
    %c0_55 = arith.constant 0 : index
    %c0_56 = arith.constant 0 : index
    %117 = vector.load %arg4[%c1_54, %c0_55, %c0_56] : memref<9x4x4xf32, #tpu.memory_space<vmem>>, vector<1x4x4xf32>
    %118 = vector.shape_cast %117 : vector<1x4x4xf32> to vector<4x4xf32>
    %cst_57 = arith.constant dense<0.000000e+00> : vector<4x256xf32>
    %119 = tpu.matmul %118, %116, %cst_57 {dimension_numbers = #tpu.dot_dimension_numbers<[1], [0], [0], [1], [0, 0, 1, 1], [], []>, precision = #tpu.contract_precision<fp32>} : vector<4x4xf32>, vector<4x256xf32>, vector<4x256xf32> -> vector<4x256xf32>
    %120 = arith.addf %111, %119 : vector<4x256xf32>
    %c15_i32_58 = arith.constant 15 : i32
    %121 = tpu.dynamic_rotate %100 by %c15_i32_58 dim 1 : vector<4x256xf32>, i32 -> vector<4x256xf32>
    %cst_59 = arith.constant 0.000000e+00 : f32
    %122 = vector.shape_cast %14 : vector<1x256xi1> to vector<1x256xi1>
    %123 = vector.broadcast %122 : vector<1x256xi1> to vector<4x256xi1>
    %124 = vector.broadcast %cst_59 : f32 to vector<4x256xf32>
    %125 = arith.select %123, %121, %124 : vector<4x256xi1>, vector<4x256xf32>
    %c2_60 = arith.constant 2 : index
    %c0_61 = arith.constant 0 : index
    %c0_62 = arith.constant 0 : index
    %126 = vector.load %arg4[%c2_60, %c0_61, %c0_62] : memref<9x4x4xf32, #tpu.memory_space<vmem>>, vector<1x4x4xf32>
    %127 = vector.shape_cast %126 : vector<1x4x4xf32> to vector<4x4xf32>
    %cst_63 = arith.constant dense<0.000000e+00> : vector<4x256xf32>
    %128 = tpu.matmul %127, %125, %cst_63 {dimension_numbers = #tpu.dot_dimension_numbers<[1], [0], [0], [1], [0, 0, 1, 1], [], []>, precision = #tpu.contract_precision<fp32>} : vector<4x4xf32>, vector<4x256xf32>, vector<4x256xf32> -> vector<4x256xf32>
    %129 = arith.addf %120, %128 : vector<4x256xf32>
    %c1_i32_64 = arith.constant 1 : i32
    %130 = tpu.dynamic_rotate %100 by %c1_i32_64 dim 1 : vector<4x256xf32>, i32 -> vector<4x256xf32>
    %cst_65 = arith.constant 0.000000e+00 : f32
    %131 = vector.shape_cast %10 : vector<1x256xi1> to vector<1x256xi1>
    %132 = vector.broadcast %131 : vector<1x256xi1> to vector<4x256xi1>
    %133 = vector.broadcast %cst_65 : f32 to vector<4x256xf32>
    %134 = arith.select %132, %130, %133 : vector<4x256xi1>, vector<4x256xf32>
    %c3_66 = arith.constant 3 : index
    %c0_67 = arith.constant 0 : index
    %c0_68 = arith.constant 0 : index
    %135 = vector.load %arg4[%c3_66, %c0_67, %c0_68] : memref<9x4x4xf32, #tpu.memory_space<vmem>>, vector<1x4x4xf32>
    %136 = vector.shape_cast %135 : vector<1x4x4xf32> to vector<4x4xf32>
    %cst_69 = arith.constant dense<0.000000e+00> : vector<4x256xf32>
    %137 = tpu.matmul %136, %134, %cst_69 {dimension_numbers = #tpu.dot_dimension_numbers<[1], [0], [0], [1], [0, 0, 1, 1], [], []>, precision = #tpu.contract_precision<fp32>} : vector<4x4xf32>, vector<4x256xf32>, vector<4x256xf32> -> vector<4x256xf32>
    %138 = arith.addf %129, %137 : vector<4x256xf32>
    %c4_70 = arith.constant 4 : index
    %c0_71 = arith.constant 0 : index
    %c0_72 = arith.constant 0 : index
    %139 = vector.load %arg4[%c4_70, %c0_71, %c0_72] : memref<9x4x4xf32, #tpu.memory_space<vmem>>, vector<1x4x4xf32>
    %140 = vector.shape_cast %139 : vector<1x4x4xf32> to vector<4x4xf32>
    %cst_73 = arith.constant dense<0.000000e+00> : vector<4x256xf32>
    %141 = tpu.matmul %140, %100, %cst_73 {dimension_numbers = #tpu.dot_dimension_numbers<[1], [0], [0], [1], [0, 0, 1, 1], [], []>, precision = #tpu.contract_precision<fp32>} : vector<4x4xf32>, vector<4x256xf32>, vector<4x256xf32> -> vector<4x256xf32>
    %142 = arith.addf %138, %141 : vector<4x256xf32>
    %c255_i32_74 = arith.constant 255 : i32
    %143 = tpu.dynamic_rotate %100 by %c255_i32_74 dim 1 : vector<4x256xf32>, i32 -> vector<4x256xf32>
    %cst_75 = arith.constant 0.000000e+00 : f32
    %144 = vector.shape_cast %12 : vector<1x256xi1> to vector<1x256xi1>
    %145 = vector.broadcast %144 : vector<1x256xi1> to vector<4x256xi1>
    %146 = vector.broadcast %cst_75 : f32 to vector<4x256xf32>
    %147 = arith.select %145, %143, %146 : vector<4x256xi1>, vector<4x256xf32>
    %c5_76 = arith.constant 5 : index
    %c0_77 = arith.constant 0 : index
    %c0_78 = arith.constant 0 : index
    %148 = vector.load %arg4[%c5_76, %c0_77, %c0_78] : memref<9x4x4xf32, #tpu.memory_space<vmem>>, vector<1x4x4xf32>
    %149 = vector.shape_cast %148 : vector<1x4x4xf32> to vector<4x4xf32>
    %cst_79 = arith.constant dense<0.000000e+00> : vector<4x256xf32>
    %150 = tpu.matmul %149, %147, %cst_79 {dimension_numbers = #tpu.dot_dimension_numbers<[1], [0], [0], [1], [0, 0, 1, 1], [], []>, precision = #tpu.contract_precision<fp32>} : vector<4x4xf32>, vector<4x256xf32>, vector<4x256xf32> -> vector<4x256xf32>
    %151 = arith.addf %142, %150 : vector<4x256xf32>
    %c241_i32_80 = arith.constant 241 : i32
    %152 = tpu.dynamic_rotate %100 by %c241_i32_80 dim 1 : vector<4x256xf32>, i32 -> vector<4x256xf32>
    %cst_81 = arith.constant 0.000000e+00 : f32
    %153 = vector.shape_cast %15 : vector<1x256xi1> to vector<1x256xi1>
    %154 = vector.broadcast %153 : vector<1x256xi1> to vector<4x256xi1>
    %155 = vector.broadcast %cst_81 : f32 to vector<4x256xf32>
    %156 = arith.select %154, %152, %155 : vector<4x256xi1>, vector<4x256xf32>
    %c6_82 = arith.constant 6 : index
    %c0_83 = arith.constant 0 : index
    %c0_84 = arith.constant 0 : index
    %157 = vector.load %arg4[%c6_82, %c0_83, %c0_84] : memref<9x4x4xf32, #tpu.memory_space<vmem>>, vector<1x4x4xf32>
    %158 = vector.shape_cast %157 : vector<1x4x4xf32> to vector<4x4xf32>
    %cst_85 = arith.constant dense<0.000000e+00> : vector<4x256xf32>
    %159 = tpu.matmul %158, %156, %cst_85 {dimension_numbers = #tpu.dot_dimension_numbers<[1], [0], [0], [1], [0, 0, 1, 1], [], []>, precision = #tpu.contract_precision<fp32>} : vector<4x4xf32>, vector<4x256xf32>, vector<4x256xf32> -> vector<4x256xf32>
    %160 = arith.addf %151, %159 : vector<4x256xf32>
    %c240_i32_86 = arith.constant 240 : i32
    %161 = tpu.dynamic_rotate %100 by %c240_i32_86 dim 1 : vector<4x256xf32>, i32 -> vector<4x256xf32>
    %cst_87 = arith.constant 0.000000e+00 : f32
    %162 = vector.shape_cast %8 : vector<1x256xi1> to vector<1x256xi1>
    %163 = vector.broadcast %162 : vector<1x256xi1> to vector<4x256xi1>
    %164 = vector.broadcast %cst_87 : f32 to vector<4x256xf32>
    %165 = arith.select %163, %161, %164 : vector<4x256xi1>, vector<4x256xf32>
    %c7_88 = arith.constant 7 : index
    %c0_89 = arith.constant 0 : index
    %c0_90 = arith.constant 0 : index
    %166 = vector.load %arg4[%c7_88, %c0_89, %c0_90] : memref<9x4x4xf32, #tpu.memory_space<vmem>>, vector<1x4x4xf32>
    %167 = vector.shape_cast %166 : vector<1x4x4xf32> to vector<4x4xf32>
    %cst_91 = arith.constant dense<0.000000e+00> : vector<4x256xf32>
    %168 = tpu.matmul %167, %165, %cst_91 {dimension_numbers = #tpu.dot_dimension_numbers<[1], [0], [0], [1], [0, 0, 1, 1], [], []>, precision = #tpu.contract_precision<fp32>} : vector<4x4xf32>, vector<4x256xf32>, vector<4x256xf32> -> vector<4x256xf32>
    %169 = arith.addf %160, %168 : vector<4x256xf32>
    %c239_i32_92 = arith.constant 239 : i32
    %170 = tpu.dynamic_rotate %100 by %c239_i32_92 dim 1 : vector<4x256xf32>, i32 -> vector<4x256xf32>
    %cst_93 = arith.constant 0.000000e+00 : f32
    %171 = vector.shape_cast %16 : vector<1x256xi1> to vector<1x256xi1>
    %172 = vector.broadcast %171 : vector<1x256xi1> to vector<4x256xi1>
    %173 = vector.broadcast %cst_93 : f32 to vector<4x256xf32>
    %174 = arith.select %172, %170, %173 : vector<4x256xi1>, vector<4x256xf32>
    %c8_94 = arith.constant 8 : index
    %c0_95 = arith.constant 0 : index
    %c0_96 = arith.constant 0 : index
    %175 = vector.load %arg4[%c8_94, %c0_95, %c0_96] : memref<9x4x4xf32, #tpu.memory_space<vmem>>, vector<1x4x4xf32>
    %176 = vector.shape_cast %175 : vector<1x4x4xf32> to vector<4x4xf32>
    %cst_97 = arith.constant dense<0.000000e+00> : vector<4x256xf32>
    %177 = tpu.matmul %176, %174, %cst_97 {dimension_numbers = #tpu.dot_dimension_numbers<[1], [0], [0], [1], [0, 0, 1, 1], [], []>, precision = #tpu.contract_precision<fp32>} : vector<4x4xf32>, vector<4x256xf32>, vector<4x256xf32> -> vector<4x256xf32>
    %178 = arith.addf %169, %177 : vector<4x256xf32>
    %cst_98 = arith.constant 0.000000e+00 : f32
    %179 = vector.broadcast %cst_98 : f32 to vector<4x256xf32>
    %180 = arith.maximumf %178, %179 : vector<4x256xf32>
    %c0_99 = arith.constant 0 : index
    %c0_100 = arith.constant 0 : index
    %c0_101 = arith.constant 0 : index
    %181 = vector.load %arg6[%c0_99, %c0_100, %c0_101] : memref<1x4x256xf32, #tpu.memory_space<vmem>>, vector<1x4x256xf32>
    %182 = vector.shape_cast %181 : vector<1x4x256xf32> to vector<4x256xf32>
    %183 = vector.shape_cast %180 : vector<4x256xf32> to vector<1x4x256xf32>
    tpu.vector_store %arg6[%c0_99, %c0_100, %c0_101], %183 {strides = array<i32>} : memref<1x4x256xf32, #tpu.memory_space<vmem>>, vector<1x4x256xf32>,
    return
  }
  func.func @transform_0(%arg0: i32) -> (i32, i32, i32) {
    %c0_i32 = arith.constant 0 : i32
    %c0_i32_0 = arith.constant 0 : i32
    %c0_i32_1 = arith.constant 0 : i32
    return %arg0, %c0_i32, %c0_i32_0 : i32, i32, i32
  }
  func.func @transform_1(%arg0: i32) -> (i32, i32, i32) {
    %c0_i32 = arith.constant 0 : i32
    %c0_i32_0 = arith.constant 0 : i32
    %c0_i32_1 = arith.constant 0 : i32
    %c0_i32_2 = arith.constant 0 : i32
    return %c0_i32, %c0_i32_0, %c0_i32_1 : i32, i32, i32
  }
  func.func @transform_2(%arg0: i32) -> (i32, i32) {
    %c0_i32 = arith.constant 0 : i32
    %c0_i32_0 = arith.constant 0 : i32
    %c0_i32_1 = arith.constant 0 : i32
    return %c0_i32, %c0_i32_0 : i32, i32
  }
  func.func @transform_3(%arg0: i32) -> (i32, i32, i32) {
    %c0_i32 = arith.constant 0 : i32
    %c0_i32_0 = arith.constant 0 : i32
    %c0_i32_1 = arith.constant 0 : i32
    %c0_i32_2 = arith.constant 0 : i32
    return %c0_i32, %c0_i32_0, %c0_i32_1 : i32, i32, i32
  }
  func.func @transform_4(%arg0: i32) -> (i32, i32) {
    %c0_i32 = arith.constant 0 : i32
    %c0_i32_0 = arith.constant 0 : i32
    %c0_i32_1 = arith.constant 0 : i32
    return %c0_i32, %c0_i32_0 : i32, i32
  }
  func.func @transform_5(%arg0: i32) -> (i32, i32, i32) {
    %c0_i32 = arith.constant 0 : i32
    %c0_i32_0 = arith.constant 0 : i32
    %c0_i32_1 = arith.constant 0 : i32
    return %arg0, %c0_i32, %c0_i32_0 : i32, i32, i32
  }
}

</mosaic_0001>

<bundles_post_ra>
// kernel: tpu_custom_call.1
= control target key start
LH: loop header
LB: loop body
LE: loop exit
PB: predicated region body
PF: predicated region fallthrough
CT: control target
= control target key end

     0   :  { %10 = vsyncpa [#allocation3], 0  ;;  %s10238_s0 = inlined_call_operand.vmem [shape: f32[2,4,256], index: 0, kind: input, shape index: {}]   ;;  %s10239_s1 = inlined_call_operand.vmem [shape: f32[9,4,4], index: 1, kind: input, shape index: {}]   ;;  %s10240_s2 = inlined_call_operand.vmem [shape: f32[4,1], index: 2, kind: input, shape index: {}]   ;;  %s10241_s3 = inlined_call_operand.vmem [shape: f32[9,4,4], index: 3, kind: input, shape index: {}]   ;;  %s10242_s4 = inlined_call_operand.vmem [shape: f32[4,1], index: 4, kind: input, shape index: {}]   ;;  %s10243_s5 = inlined_call_operand.hbm [shape: f32[2,4,256], index: 5, kind: output, shape index: {}]  }
   0x1   :  { %12 = vsyncpa [#allocation3 + $0x1], 0  ;;  %s9517_s18 = smov 0   ;;  %s9519_s19 = smov 0  }
   0x2   :  { %s9521_s20 = smov 0   ;;  %s9523_s21 = smov 0  }
   0x3 LB: > { %s9538_s22 = sadd.s32 4294967295, %s9474_s21   ;;  %s9115_s23 = sadd.s32 4294967294, %s9474_s21   ;;  %s9474_s21 = sphi %s9523_s21, %s10291_s21   ;;  %s9470_s20 = sphi %s9521_s20, %s10290_s20   ;;  %s9466_s19 = sphi %s9519_s19, %s10289_s19   ;;  %s9462_s18 = sphi %s9517_s18, %s10288_s18  }
   0x4   : > { %s9542_s24 = sadd.s32 1, %s9474_s21   ;;  %s135_s25 = sadd.s32 1, %s9470_s20 }
   0x5   : > { %s132_s26 = ssub.s32 %s9474_s21, %s9542_s24  ;;  %p145_p0 = scmp.ne.s32.totalorder %s9470_s20, %s9466_s19 }
   0x6   : > { %p133_p1 = scmp.eq.s32.totalorder %s132_s26, 0  ;;  %p146_p2 = scmp.eq.s32.totalorder %s9538_s22, 1 }
   0x7   : > { %p151_p3 = scmp.ne.s32.totalorder %s9466_s19, %s9462_s18  ;;  %p152_p4 = scmp.eq.s32.totalorder %s9115_s23, 1 }
   0x8   : > { %s9553_s27 = scalar_select %p133_p1, %s9470_s20, %s135_s25  }
   0x9   : > { %p9555_p5 = por %p146_p2, %p145_p0  ;;  %p9559_p6 = por %p152_p4, %p151_p3 }
   0xa   : > { %p9118_p7 = scmp.ge.s32.totalorder %s9474_s21, 1  ;;  %p190_p8 = scmp.lt.s32.totalorder %s9474_s21, 3 }
   0xc   : > { %p191_p9 = pnand %p9118_p7, %p190_p8 }
   0xd   : > { %p218_p10 = scmp.lt.s32.totalorder (!%p191_p9), %s9538_s22, 1  ;;  %v9476_v0 = vmov (!%p191_p9), 0.0   ;;  %s9477_s10 = smov (!%p191_p9), 17   ;;  %v223_v3 = vlaneseq (!%p191_p9)  ;;  %v270_v4 = vld [vmem:[%s10239_s1] sm:$0xf] (!%p191_p9)  ;;  %vm271_vm0 = vcmask (!%p191_p9), 31744  }
   0xe   : > { %194 = sbr.rel (%p191_p9) target bundleno = 1575 (0x627), region = 40  ;;  %348 = vmatprep.mubr.f32.mxu0 (!%p191_p9), %v9476_v0  ;;  %4753 = vmatprep.mubr.f32.mxu1 (!%p191_p9), %v9476_v0  ;;  %s9478_s11 = smov (!%p191_p9), 16   ;;  %v273_v6 = vsel (!%p191_p9), %vm271_vm0, %v270_v4, 0  ;;  %vm275_vm8 = vcmask (!%p191_p9), 1043456   ;;  %v9122_v46 = vld [vmem:[%s10239_s1 + $0x4] sm:$0xf] (!%p191_p9) }
   0xf   : > { %s9479_s12 = smov (!%p191_p9), 15   ;;  %s9480_s13 = smov (!%p191_p9), 1   ;;  %v9597_v5 = vand.u32 (!%p191_p9), 127, %v223_v3  ;;  %v9607_v8 = vand.u32 (!%p191_p9), 4294901760, %v273_v6  ;;  %v765_v48 = vsel (!%p191_p9), %vm271_vm0, %v9122_v46, 0 }
  0x10   : > { %s9481_s16 = smov (!%p191_p9), 127   ;;  %s9482_s25 = smov (!%p191_p9), 113   ;;  %v9690_v51 = vand.u32 (!%p191_p9), 4294901760, %v765_v48 }
  0x11   : > { %v9605_v7 = vadd.s32 (!%p191_p9), 128, %v9597_v5  ;;  %v226_v9 = vand.u32 (!%p191_p9), 15, %v9597_v5  ;;  %v228_v10 = vshra.s32 (!%p191_p9), %v9597_v5, 4  ;;  %v350_v13 = vsub.f32 (!%p191_p9), %v273_v6, %v9607_v8 }
  0x12   : > { %vm261_vm6 = vcmp.lt.s32.totalorder (!%p191_p9), %v9597_v5, 17  ;;  %vm10249_vm9 = vcmp.lt.s32.totalorder (!%p191_p9), %v9597_v5, 16  ;;  %v841_v54 = vsub.f32 (!%p191_p9), %v765_v48, %v9690_v51  ;;  %vm10248_vm11 = vcmp.lt.s32.totalorder (!%p191_p9), %v9597_v5, 15 }
  0x13   : > { %v227_v11 = vand.u32 (!%p191_p9), 15, %v9605_v7  ;;  %v229_v12 = vshra.s32 (!%p191_p9), %v9605_v7, 4  ;;  %vm9616_vm1 = vcmp.ge.s32.totalorder (!%p191_p9), %v228_v10, 1  ;;  %vm9622_vm2 = vcmp.ge.s32.totalorder (!%p191_p9), %v226_v9, 1 }
  0x14   : > { %v351_v19 = vand.u32 (!%p191_p9), 4294901760, %v350_v13  ;;  %vm238_vm5 = vmand (!%p191_p9), %vm9616_vm1, %vm9622_vm2  ;;  %v842_v57 = vand.u32 (!%p191_p9), 4294901760, %v841_v54  ;;  %vm9723_vm13 = vcmp.le.s32.totalorder (!%p191_p9), %v226_v9, 14  ;;  %vm10244_vm15 = vcmp.lt.s32.totalorder (!%p191_p9), %v9597_v5, 1 }
  0x15   : > { %s219_s30 = scalar_select %p218_p10, %s9538_s22, 1  ;;  %vm9628_vm3 = vcmp.ge.s32.totalorder %v229_v12, 1  ;;  %vm9634_vm4 = vcmp.ge.s32.totalorder %v227_v11, 1  ;;  %vm9704_vm10 = vcmp.le.s32.totalorder %v227_v11, 14  ;;  %vm10246_vm14 = vmand %vm9616_vm1, %vm9723_vm13 }
  0x16   : > { %vm239_vm7 = vmand %vm9628_vm3, %vm9634_vm4  ;;  %v352_v21 = vsub.f32 %v350_v13, %v351_v19  ;;  %v843_v60 = vsub.f32 %v841_v54, %v842_v57 }
  0x17   : > { %s9143_s6 = sshll.u32 %s219_s30, 3  ;;  %vm10247_vm12 = vmand %vm9628_vm3, %vm9704_vm10 }
  0x18   : > { %s222_s9 = scalar_lea.vmem %s10238_s0, %s9143_s6  ;;  %v353_v30 = vand.u32 4294901760, %v352_v21  ;;  %v844_v62 = vand.u32 4294901760, %v843_v60  ;;  %v9123_v21 = vld [vmem:[%s10239_s1 + $0x8] sm:$0xf]  ;;  %s9483_s6 = smov 112  }
  0x19   : > { %v9572_v1 = vld [vmem:[%s222_s9] sm:$0xff]  ;;  %s9484_s9 = smov 111  }
  0x1a   : > { %257 = vrot.lane.b32.xlu0 %v9572_v1, %s9477_s10  ;;  %v9578_v2 = vcombine.high %v9572_v1, %v9572_v1  ;;  %749 = vrot.lane.b32.xlu1 %v9572_v1, %s9478_s11 }
  0x1e   : > { %259 = vrot.lane.b32.xlu0 %v9578_v2, %s9477_s10  ;;  %751 = vrot.lane.b32.xlu1 %v9578_v2, %s9478_s11 }
  0x22   : > { %1242 = vrot.lane.b32.xlu1 %v9578_v2, %s9479_s12  ;;  %1240 = vrot.lane.b32.xlu0 %v9572_v1, %s9479_s12 }
  0x26   : > { %1733 = vrot.lane.b32.xlu1 %v9578_v2, %s9480_s13  ;;  %1731 = vrot.lane.b32.xlu0 %v9572_v1, %s9480_s13 }
  0x2a   : > { %2700 = vrot.lane.b32.xlu1 %v9578_v2, %s9481_s16  ;;  %2698 = vrot.lane.b32.xlu0 %v9572_v1, %s9481_s16 }
  0x2e   : > { %3191 = vrot.lane.b32.xlu1 %v9578_v2, %s9482_s25  ;;  %3189 = vrot.lane.b32.xlu0 %v9572_v1, %s9482_s25 }
  0x32   : > { %3682 = vrot.lane.b32.xlu1 %v9578_v2, %s9483_s6  ;;  %3680 = vrot.lane.b32.xlu0 %v9572_v1, %s9483_s6 }
  0x36   : > { %4173 = vrot.lane.b32.xlu1 %v9578_v2, %s9484_s9  ;;  %4171 = vrot.lane.b32.xlu0 %v9572_v1, %s9484_s9 }
  0x8c   : > { %v258_v16 = vpop.permute.xlu0 %257  ;;  %v750_v39 = vpop.permute.xlu1 %749 }
  0x90   : > { %v260_v20 = vpop.permute.xlu0 %259  ;;  %v752_v40 = vpop.permute.xlu1 %751 }
  0x91   : > { %v262_v22 = vsel %vm261_vm6, %v258_v16, %v260_v20  ;;  %v263_v23 = vsel %vm261_vm6, %v260_v20, %v258_v16  ;;  %v754_v41 = vsel %vm10249_vm9, %v750_v39, %v752_v40  ;;  %v755_v44 = vsel %vm10249_vm9, %v752_v40, %v750_v39 }
  0x92   : > { %v268_v24 = vsel %vm238_vm5, %v263_v23, 0.0  ;;  %v269_v25 = vsel %vm239_vm7, %v262_v22, 0.0  ;;  %v761_v42 = vsel %vm9628_vm3, %v754_v41, 0.0  ;;  %v760_v47 = vsel %vm9616_vm1, %v755_v44, 0.0 }
  0x93   : > { %v277_v26 = vsel %vm275_vm8, %v268_v24, 0  ;;  %v280_v27 = vsel %vm275_vm8, %v269_v25, 0  ;;  %v771_v43 = vsel %vm275_vm8, %v761_v42, 0  ;;  %v768_v50 = vsel %vm275_vm8, %v760_v47, 0 }
  0x94   : > { %v282_v28 = vand.u32 4294901760, %v280_v27  ;;  %v284_v29 = vand.u32 4294901760, %v277_v26  ;;  %v9675_v45 = vand.u32 4294901760, %v771_v43  ;;  %v775_v53 = vand.u32 4294901760, %v768_v50  ;;  %v1243_v3 = vpop.permute.xlu1 %1242  ;;  %v1241_v6 = vpop.permute.xlu0 %1240 }
  0x95   : > { %v1256_v22 = vsel %vm271_vm0, %v9123_v21, 0 }
  0x96   : > { %v361_v31 = vsub.f32 %v280_v27, %v282_v28  ;;  %v367_v32 = vsub.f32 %v277_v26, %v284_v29  ;;  %283 = vmatprep.subr.mxu0 %v282_v28  ;;  %v852_v49 = vsub.f32 %v771_v43, %v9675_v45  ;;  %v858_v56 = vsub.f32 %v768_v50, %v775_v53 }
  0x97   : > { %285 = vmatpush1.msra.mxu0 %v284_v29  ;;  %v9750_v25 = vand.u32 4294901760, %v1256_v22 }
  0x98   : > { %v368_v33 = vand.u32 4294901760, %v367_v32  ;;  %354 = vmatmul.mubr.f32.vlgmr.msra.gmra.mrb[0].mxu0 %v353_v30  ;;  %v362_v34 = vand.u32 4294901760, %v361_v31  ;;  %v853_v52 = vand.u32 4294901760, %v852_v49  ;;  %v859_v59 = vand.u32 4294901760, %v858_v56  ;;  %v1732_v39 = vpop.permute.xlu0 %1731 }
  0x99   : > { %434 = vmatprep.mubr.f32.mxu0 %v9476_v0 }
  0x9a   : > { %v363_v35 = vsub.f32 %v361_v31, %v362_v34  ;;  %v369_v36 = vsub.f32 %v367_v32, %v368_v33  ;;  %v854_v55 = vsub.f32 %v852_v49, %v853_v52  ;;  %v860_v61 = vsub.f32 %v858_v56, %v859_v59 }
  0x9c   : > { %v364_v37 = vand.u32 4294901760, %v363_v35  ;;  %v370_v38 = vand.u32 4294901760, %v369_v36  ;;  %v855_v58 = vand.u32 4294901760, %v854_v55  ;;  %v861_v63 = vand.u32 4294901760, %v860_v61 }
  0x9e   : > { %365 = vmatprep.subr.mxu0 %v364_v37 }
  0x9f   : > { %371 = vmatpush1.msra.mxu0 %v370_v38  ;;  %v1734_v38 = vpop.permute.xlu1 %1733 }
  0xa0   : > { %436 = vmatmul.mubr.f32.vlgmr.msra.gmra.mrb[0].mxu0 %v9607_v8  ;;  %444 = vmatprep.subr.mxu0 %v361_v31  ;;  %v1736_v40 = vsel %vm10244_vm15, %v1732_v39, %v1734_v38  ;;  %v1737_v43 = vsel %vm10244_vm15, %v1734_v38, %v1732_v39  ;;  %vm10245_vm15 = vcmp.lt.s32.totalorder %v9597_v5, 127 }
  0xa1   : > { %447 = vmatpush1.msra.mxu0 %v367_v32  ;;  %510 = vmatprep.mubr.f32.mxu0 %v9476_v0  ;;  %v1743_v41 = vsel %vm9634_vm4, %v1736_v40, 0.0  ;;  %v1742_v46 = vsel %vm9622_vm2, %v1737_v43, 0.0 }
  0xa2   : > { %520 = vmatprep.subr.mxu0 %v282_v28  ;;  %v1753_v42 = vsel %vm275_vm8, %v1743_v41, 0  ;;  %v1750_v48 = vsel %vm275_vm8, %v1742_v46, 0 }
  0xa3   : > { %v1755_v44 = vand.u32 4294901760, %v1753_v42 }
  0xa8   : > { %513 = vmatmul.mubr.f32.vlgmr.msra.gmra.mrb[0].mxu0 %v350_v13 }
  0xa9   : > { %522 = vmatpush1.msra.mxu0 %v284_v29  ;;  %585 = vmatprep.mubr.f32.mxu0 %v9476_v0 }
  0xaa   : > { %598 = vmatprep.subr.mxu0 %v362_v34 }
  0xb0   : > { %589 = vmatmul.mubr.f32.vlgmr.msra.gmra.mrb[0].mxu0 %v351_v19  ;;  %v1246_v19 = vsel %vm10248_vm11, %v1243_v3, %v1241_v6 }
  0xb1   : > { %602 = vmatpush1.msra.mxu0 %v368_v33  ;;  %665 = vmatprep.mubr.f32.mxu0 %v9476_v0  ;;  %v1251_v9 = vsel %vm10246_vm14, %v1246_v19, 0.0  ;;  %vm10253_vm14 = vcmp.lt.s32.totalorder %v9597_v5, 113 }
  0xb2   : > { %674 = vmatprep.subr.mxu0 %v282_v28  ;;  %v1259_v23 = vsel %vm275_vm8, %v1251_v9, 0  ;;  %v1332_v28 = vsub.f32 %v1256_v22, %v9750_v25 }
  0xb3   : > { %v1266_v26 = vand.u32 4294901760, %v1259_v23 }
  0xb4   : > { %v1333_v31 = vand.u32 4294901760, %v1332_v28 }
  0xb6   : > { %v1334_v34 = vsub.f32 %v1332_v28, %v1333_v31 }
  0xb8   : > { %667 = vmatmul.mubr.f32.vlgmr.msra.gmra.mrb[0].mxu0 %v9607_v8  ;;  %v1335_v36 = vand.u32 4294901760, %v1334_v34 }
  0xb9   : > { %676 = vmatpush1.msra.mxu0 %v284_v29  ;;  %739 = vmatprep.mubr.f32.mxu0 %v9476_v0  ;;  %v1349_v29 = vsub.f32 %v1259_v23, %v1266_v26 }
  0xba   : > { %774 = vmatprep.subr.mxu0 %v9675_v45 }
  0xbb   : > { %v1350_v32 = vand.u32 4294901760, %v1349_v29 }
  0xbd   : > { %v1351_v35 = vsub.f32 %v1349_v29, %v1350_v32 }
  0xbf   : > { %v1352_v37 = vand.u32 4294901760, %v1351_v35 }
  0xc0   : > { %741 = vmatmul.mubr.f32.vlgmr.msra.gmra.mrb[0].mxu0 %v9607_v8  ;;  %v1245_v8 = vsel %vm10248_vm11, %v1241_v6, %v1243_v3  ;;  %v9125_v6 = vld [vmem:[%s10239_s1 + $0x10] sm:$0xf]  ;;  %vm9847_vm11 = vcmp.le.s32.totalorder %v228_v10, 14 }
  0xc1   : > { %776 = vmatpush1.msra.mxu0 %v775_v53  ;;  %839 = vmatprep.mubr.f32.mxu0 %v9476_v0  ;;  %v1252_v11 = vsel %vm10247_vm12, %v1245_v8, 0.0  ;;  %v2225_v8 = vsel %vm271_vm0, %v9125_v6, 0  ;;  %vm10250_vm9 = vmand %vm9847_vm11, %vm9622_vm2 }
  0xc2   : > { %856 = vmatprep.subr.mxu0 %v855_v58  ;;  %v1262_v16 = vsel %vm275_vm8, %v1252_v11, 0  ;;  %v2227_v11 = vsel %vm275_vm8, %v9572_v1, 0  ;;  %v2298_v19 = vand.u32 4294901760, %v2225_v8 }
  0xc3   : > { %v1264_v20 = vand.u32 4294901760, %v1262_v16 }
  0xc5   : > { %v1343_v24 = vsub.f32 %v1262_v16, %v1264_v20 }
  0xc7   : > { %v1344_v27 = vand.u32 4294901760, %v1343_v24 }
  0xc8   : > { %845 = vmatmul.mubr.f32.vlgmr.msra.gmra.mrb[0].mxu0 %v844_v62 }
  0xc9   : > { %862 = vmatpush1.msra.mxu0 %v861_v63  ;;  %925 = vmatprep.mubr.f32.mxu0 %v9476_v0  ;;  %v1345_v30 = vsub.f32 %v1343_v24, %v1344_v27  ;;  %v2229_v63 = vsel %vm275_vm8, %v9578_v2, 0  ;;  %v2299_v2 = vsub.f32 %v2225_v8, %v2298_v19 }
  0xca   : > { %935 = vmatprep.subr.mxu0 %v852_v49  ;;  %v1834_v49 = vsub.f32 %v1753_v42, %v1755_v44  ;;  %v2231_v3 = vand.u32 4294901760, %v2229_v63 }
  0xcb   : > { %v1346_v33 = vand.u32 4294901760, %v1345_v30  ;;  %v2300_v23 = vand.u32 4294901760, %v2299_v2  ;;  %v2699_v30 = vpop.permute.xlu0 %2698 }
  0xcc   : > { %v2310_v16 = vsub.f32 %v2229_v63, %v2231_v3 }
  0xce   : > { %v2311_v21 = vand.u32 4294901760, %v2310_v16 }
  0xd0   : > { %927 = vmatmul.mubr.f32.vlgmr.msra.gmra.mrb[0].mxu0 %v9690_v51  ;;  %v2312_v22 = vsub.f32 %v2310_v16, %v2311_v21 }
  0xd1   : > { %938 = vmatpush1.msra.mxu0 %v858_v56  ;;  %1001 = vmatprep.mubr.f32.mxu0 %v9476_v0 }
  0xd2   : > { %1011 = vmatprep.subr.mxu0 %v9675_v45 }
  0xd8   : > { %1004 = vmatmul.mubr.f32.vlgmr.msra.gmra.mrb[0].mxu0 %v841_v54 }
  0xd9   : > { %1013 = vmatpush1.msra.mxu0 %v775_v53  ;;  %1076 = vmatprep.mubr.f32.mxu0 %v9476_v0 }
  0xda   : > { %1089 = vmatprep.subr.mxu0 %v853_v52  ;;  %v1835_v52 = vand.u32 4294901760, %v1834_v49 }
  0xdc   : > { %v1836_v55 = vsub.f32 %v1834_v49, %v1835_v52 }
  0xde   : > { %v1837_v58 = vand.u32 4294901760, %v1836_v55 }
  0xe0   : > { %1080 = vmatmul.mubr.f32.vlgmr.msra.gmra.mrb[0].mxu0 %v842_v57 }
  0xe1   : > { %1093 = vmatpush1.msra.mxu0 %v859_v59  ;;  %1156 = vmatprep.mubr.f32.mxu0 %v9476_v0 }
  0xe2   : > { %1165 = vmatprep.subr.mxu0 %v9675_v45  ;;  %v9124_v45 = vld [vmem:[%s10239_s1 + $0xc] sm:$0xf] }
  0xe3   : > { %v1747_v47 = vsel %vm271_vm0, %v9124_v45, 0 }
  0xe4   : > { %v1822_v50 = vand.u32 4294901760, %v1747_v47 }
  0xe8   : > { %1158 = vmatmul.mubr.f32.vlgmr.msra.gmra.mrb[0].mxu0 %v9690_v51 }
  0xe9   : > { %1167 = vmatpush1.msra.mxu0 %v775_v53  ;;  %1230 = vmatprep.mubr.f32.mxu0 %v9476_v0  ;;  %v1823_v53 = vsub.f32 %v1747_v47, %v1822_v50 }
  0xea   : > { %1265 = vmatprep.subr.mxu0 %v1264_v20 }
  0xeb   : > { %v1824_v56 = vand.u32 4294901760, %v1823_v53 }
  0xed   : > { %v1825_v59 = vsub.f32 %v1823_v53, %v1824_v56 }
  0xef   : > { %v1826_v61 = vand.u32 4294901760, %v1825_v59 }
  0xf0   : > { %1232 = vmatmul.mubr.f32.vlgmr.msra.gmra.mrb[0].mxu0 %v9690_v51  ;;  %v1757_v51 = vand.u32 4294901760, %v1750_v48 }
  0xf1   : > { %1267 = vmatpush1.msra.mxu0 %v1266_v26  ;;  %1330 = vmatprep.mubr.f32.mxu0 %v9476_v0 }
  0xf2   : > { %1347 = vmatprep.subr.mxu0 %v1346_v33  ;;  %v1840_v54 = vsub.f32 %v1750_v48, %v1757_v51 }
  0xf4   : > { %v1841_v57 = vand.u32 4294901760, %v1840_v54 }
  0xf6   : > { %v1842_v60 = vsub.f32 %v1840_v54, %v1841_v57 }
  0xf8   : > { %1336 = vmatmul.mubr.f32.vlgmr.msra.gmra.mrb[0].mxu0 %v1335_v36  ;;  %v1843_v62 = vand.u32 4294901760, %v1842_v60  ;;  %v9126_v36 = vld [vmem:[%s10239_s1 + $0x14] sm:$0xf] }
  0xf9   : > { %1353 = vmatpush1.msra.mxu0 %v1352_v37  ;;  %1416 = vmatprep.mubr.f32.mxu0 %v9476_v0  ;;  %v2714_v38 = vsel %vm271_vm0, %v9126_v36, 0 }
  0xfa   : > { %1426 = vmatprep.subr.mxu0 %v1343_v24  ;;  %v9818_v41 = vand.u32 4294901760, %v2714_v38 }
 0x100   : > { %1418 = vmatmul.mubr.f32.vlgmr.msra.gmra.mrb[0].mxu0 %v9750_v25 }
 0x101   : > { %1429 = vmatpush1.msra.mxu0 %v1349_v29  ;;  %1492 = vmatprep.mubr.f32.mxu0 %v9476_v0  ;;  %v2701_v29 = vpop.permute.xlu1 %2700 }
 0x102   : > { %1502 = vmatprep.subr.mxu0 %v1264_v20  ;;  %v2703_v34 = vsel %vm10245_vm15, %v2699_v30, %v2701_v29 }
 0x103   : > { %v2709_v37 = vsel %vm9723_vm13, %v2703_v34, 0.0  ;;  %v9128_v34 = vld [vmem:[%s10239_s1 + $0x1c] sm:$0xf] }
 0x104   : > { %v2717_v39 = vsel %vm275_vm8, %v2709_v37, 0  ;;  %v3696_v36 = vsel %vm271_vm0, %v9128_v34, 0 }
 0x105   : > { %v2724_v42 = vand.u32 4294901760, %v2717_v39 }
 0x107   : > { %v2807_v45 = vsub.f32 %v2717_v39, %v2724_v42  ;;  %v9899_v39 = vand.u32 4294901760, %v3696_v36 }
 0x108   : > { %1495 = vmatmul.mubr.f32.vlgmr.msra.gmra.mrb[0].mxu0 %v1332_v28 }
 0x109   : > { %1504 = vmatpush1.msra.mxu0 %v1266_v26  ;;  %1567 = vmatprep.mubr.f32.mxu0 %v9476_v0  ;;  %v2808_v48 = vand.u32 4294901760, %v2807_v45 }
 0x10a   : > { %1580 = vmatprep.subr.mxu0 %v1344_v27 }
 0x110   : > { %1571 = vmatmul.mubr.f32.vlgmr.msra.gmra.mrb[0].mxu0 %v1333_v31  ;;  %v2704_v31 = vsel %vm10245_vm15, %v2701_v29, %v2699_v30  ;;  %vm9828_vm15 = vcmp.le.s32.totalorder %v229_v12, 14 }
 0x111   : > { %1584 = vmatpush1.msra.mxu0 %v1350_v32  ;;  %1647 = vmatprep.mubr.f32.mxu0 %v9476_v0  ;;  %v2710_v32 = vsel %vm9704_vm10, %v2704_v31, 0.0  ;;  %vm10252_vm12 = vmand %vm9828_vm15, %vm9634_vm4 }
 0x112   : > { %1656 = vmatprep.subr.mxu0 %v1264_v20  ;;  %v2233_v20 = vand.u32 4294901760, %v2227_v11  ;;  %v2720_v33 = vsel %vm275_vm8, %v2710_v32, 0 }
 0x113   : > { %v2722_v35 = vand.u32 4294901760, %v2720_v33 }
 0x114   : > { %v2316_v9 = vsub.f32 %v2227_v11, %v2233_v20 }
 0x115   : > { %v2801_v40 = vsub.f32 %v2720_v33, %v2722_v35 }
 0x116   : > { %v2317_v24 = vand.u32 4294901760, %v2316_v9 }
 0x117   : > { %v2802_v43 = vand.u32 4294901760, %v2801_v40 }
 0x118   : > { %1649 = vmatmul.mubr.f32.vlgmr.msra.gmra.mrb[0].mxu0 %v9750_v25  ;;  %v2318_v1 = vsub.f32 %v2316_v9, %v2317_v24 }
 0x119   : > { %1658 = vmatpush1.msra.mxu0 %v1266_v26  ;;  %1721 = vmatprep.mubr.f32.mxu0 %v9476_v0  ;;  %v2301_v26 = vsub.f32 %v2299_v2, %v2300_v23  ;;  %v2803_v46 = vsub.f32 %v2801_v40, %v2802_v43 }
 0x11a   : > { %1756 = vmatprep.subr.mxu0 %v1755_v44  ;;  %v2319_v28 = vand.u32 4294901760, %v2318_v1 }
 0x11b   : > { %v2302_v27 = vand.u32 4294901760, %v2301_v26  ;;  %v246_v26 = vld [vmem:[%s10240_s2] sm:$0xf] }
 0x120   : > { %1723 = vmatmul.mubr.f32.vlgmr.msra.gmra.mrb[0].mxu0 %v9750_v25  ;;  %v2313_v25 = vand.u32 4294901760, %v2312_v22 }
 0x121   : > { %1758 = vmatpush1.msra.mxu0 %v1757_v51  ;;  %1821 = vmatprep.mubr.f32.mxu0 %v9476_v0 }
 0x122   : > { %1838 = vmatprep.subr.mxu0 %v1837_v58 }
 0x128   : > { %1827 = vmatmul.mubr.f32.vlgmr.msra.gmra.mrb[0].mxu0 %v1826_v61  ;;  %v9127_v61 = vld [vmem:[%s10239_s1 + $0x18] sm:$0xf] }
 0x129   : > { %1844 = vmatpush1.msra.mxu0 %v1843_v62  ;;  %1907 = vmatprep.mubr.f32.mxu0 %v9476_v0  ;;  %v3205_v62 = vsel %vm271_vm0, %v9127_v61, 0 }
 0x12a   : > { %1917 = vmatprep.subr.mxu0 %v1834_v49  ;;  %v2804_v49 = vand.u32 4294901760, %v2803_v46  ;;  %v9869_v6 = vand.u32 4294901760, %v3205_v62 }
 0x130   : > { %1909 = vmatmul.mubr.f32.vlgmr.msra.gmra.mrb[0].mxu0 %v1822_v50 }
 0x131   : > { %1920 = vmatpush1.msra.mxu0 %v1840_v54  ;;  %1983 = vmatprep.mubr.f32.mxu0 %v9476_v0  ;;  %v3192_v54 = vpop.permute.xlu1 %3191 }
 0x132   : > { %1993 = vmatprep.subr.mxu0 %v1755_v44 }
 0x135   : > { %v3683_v1 = vpop.permute.xlu1 %3682 }
 0x138   : > { %1986 = vmatmul.mubr.f32.vlgmr.msra.gmra.mrb[0].mxu0 %v1823_v53 }
 0x139   : > { %1995 = vmatpush1.msra.mxu0 %v1757_v51  ;;  %2058 = vmatprep.mubr.f32.mxu0 %v9476_v0 }
 0x13a   : > { %2071 = vmatprep.subr.mxu0 %v1835_v52 }
 0x140   : > { %2062 = vmatmul.mubr.f32.vlgmr.msra.gmra.mrb[0].mxu0 %v1824_v56  ;;  %v3190_v56 = vpop.permute.xlu0 %3189 }
 0x141   : > { %2075 = vmatpush1.msra.mxu0 %v1841_v57  ;;  %2138 = vmatprep.mubr.f32.mxu0 %v9476_v0  ;;  %v3195_v57 = vsel %vm10253_vm14, %v3192_v54, %v3190_v56  ;;  %v3194_v59 = vsel %vm10253_vm14, %v3190_v56, %v3192_v54  ;;  %vm244_vm14 = vmand %vm9847_vm11, %vm9723_vm13 }
 0x142   : > { %2147 = vmatprep.subr.mxu0 %v1755_v44  ;;  %v2790_v44 = vsub.f32 %v2714_v38, %v9818_v41  ;;  %v3201_v7 = vsel %vm10252_vm12, %v3195_v57, 0.0  ;;  %v3200_v10 = vsel %vm10250_vm9, %v3194_v59, 0.0  ;;  %vm10251_vm9 = vcmp.lt.s32.totalorder %v9597_v5, 112  ;;  %vm245_vm12 = vmand %vm9828_vm15, %vm9704_vm10  ;;  %v9129_v59 = vld [vmem:[%s10239_s1 + $0x20] sm:$0xf] }
 0x143   : > { %v3211_v58 = vsel %vm275_vm8, %v3201_v7, 0  ;;  %v3208_v63 = vsel %vm275_vm8, %v3200_v10, 0  ;;  %v4187_v61 = vsel %vm271_vm0, %v9129_v59, 0 }
 0x144   : > { %v2791_v47 = vand.u32 4294901760, %v2790_v44  ;;  %v3213_v60 = vand.u32 4294901760, %v3211_v58  ;;  %v3215_v8 = vand.u32 4294901760, %v3208_v63 }
 0x148   : > { %2140 = vmatmul.mubr.f32.vlgmr.msra.gmra.mrb[0].mxu0 %v1822_v50 }
 0x149   : > { %2149 = vmatpush1.msra.mxu0 %v1757_v51  ;;  %2212 = vmatprep.mubr.f32.mxu0 %v9476_v0  ;;  %v2809_v51 = vsub.f32 %v2807_v45, %v2808_v48 }
 0x14a   : > { %2232 = vmatprep.subr.mxu0 %v2231_v3 }
 0x14b   : > { %v2810_v53 = vand.u32 4294901760, %v2809_v51 }
 0x150   : > { %2214 = vmatmul.mubr.f32.vlgmr.msra.gmra.mrb[0].mxu0 %v1822_v50  ;;  %v2792_v50 = vsub.f32 %v2790_v44, %v2791_v47 }
 0x151   : > { %2234 = vmatpush1.msra.mxu0 %v2233_v20  ;;  %2297 = vmatprep.mubr.f32.mxu0 %v9476_v0 }
 0x152   : > { %2314 = vmatprep.subr.mxu0 %v2313_v25  ;;  %v2793_v52 = vand.u32 4294901760, %v2792_v50 }
 0x158   : > { %2303 = vmatmul.mubr.f32.vlgmr.msra.gmra.mrb[0].mxu0 %v2302_v27  ;;  %v3681_v27 = vpop.permute.xlu0 %3680 }
 0x159   : > { %2320 = vmatpush1.msra.mxu0 %v2319_v28  ;;  %2383 = vmatprep.mubr.f32.mxu0 %v9476_v0  ;;  %v9485_v28 = vmov 0   ;;  %v3686_v29 = vsel %vm10251_vm9, %v3683_v1, %v3681_v27  ;;  %v3685_v32 = vsel %vm10251_vm9, %v3681_v27, %v3683_v1  ;;  %vm4175_vm9 = vcmp.lt.s32.totalorder %v9597_v5, 111 }
 0x15a   : > { %2393 = vmatprep.subr.mxu0 %v2310_v16  ;;  %v3281_v16 = vsub.f32 %v3205_v62, %v9869_v6  ;;  %9410 = vset.pattern.permute.xlu0 %v9485_v28  ;;  %v3692_v30 = vsel %vm9828_vm15, %v3686_v29, 0.0 }
 0x15b   : > { %251 = vperm.xlu0 %9410, %v246_v26   ;;  %v3702_v31 = vsel %vm275_vm8, %v3692_v30, 0  ;;  %v247_v30 = vld [vmem:[%s10242_s4] sm:$0xf] }
 0x15c   : > { %v3704_v33 = vand.u32 4294901760, %v3702_v31 }
 0x15e   : > { %v3783_v38 = vsub.f32 %v3702_v31, %v3704_v33  ;;  %v4677_v31 = vld [vmem:[%s10241_s3] sm:$0xf] }
 0x160   : > { %2385 = vmatmul.mubr.f32.vlgmr.msra.gmra.mrb[0].mxu0 %v2298_v19 }
 0x161   : > { %2396 = vmatpush1.msra.mxu0 %v2316_v9  ;;  %2459 = vmatprep.mubr.f32.mxu0 %v9476_v0 }
 0x162   : > { %2469 = vmatprep.subr.mxu0 %v2231_v3 }
 0x168   : > { %2462 = vmatmul.mubr.f32.vlgmr.msra.gmra.mrb[0].mxu0 %v2299_v2 }
 0x169   : > { %2471 = vmatpush1.msra.mxu0 %v2233_v20  ;;  %2534 = vmatprep.mubr.f32.mxu0 %v9476_v0 }
 0x16a   : > { %2547 = vmatprep.subr.mxu0 %v2311_v21  ;;  %v3282_v21 = vand.u32 4294901760, %v3281_v16 }
 0x16c   : > { %v3283_v22 = vsub.f32 %v3281_v16, %v3282_v21 }
 0x170   : > { %2538 = vmatmul.mubr.f32.vlgmr.msra.gmra.mrb[0].mxu0 %v2300_v23 }
 0x171   : > { %2551 = vmatpush1.msra.mxu0 %v2317_v24  ;;  %2614 = vmatprep.mubr.f32.mxu0 %v9476_v0  ;;  %v3284_v24 = vand.u32 4294901760, %v3283_v22 }
 0x172   : > { %2623 = vmatprep.subr.mxu0 %v2231_v3  ;;  %v3292_v3 = vsub.f32 %v3211_v58, %v3213_v60 }
 0x174   : > { %v3293_v11 = vand.u32 4294901760, %v3292_v3 }
 0x178   : > { %2616 = vmatmul.mubr.f32.vlgmr.msra.gmra.mrb[0].mxu0 %v2298_v19 }
 0x179   : > { %2625 = vmatpush1.msra.mxu0 %v2233_v20  ;;  %2688 = vmatprep.mubr.f32.mxu0 %v9476_v0  ;;  %v3294_v20 = vsub.f32 %v3292_v3, %v3293_v11 }
 0x17a   : > { %2723 = vmatprep.subr.mxu0 %v2722_v35 }
 0x17b   : > { %v3295_v9 = vand.u32 4294901760, %v3294_v20 }
 0x180   : > { %2690 = vmatmul.mubr.f32.vlgmr.msra.gmra.mrb[0].mxu0 %v2298_v19  ;;  %v3298_v19 = vsub.f32 %v3208_v63, %v3215_v8  ;;  %v4262_v63 = vand.u32 4294901760, %v4187_v61 }
 0x181   : > { %2725 = vmatpush1.msra.mxu0 %v2724_v42  ;;  %2788 = vmatprep.mubr.f32.mxu0 %v9476_v0 }
 0x182   : > { %2805 = vmatprep.subr.mxu0 %v2804_v49  ;;  %v3299_v2 = vand.u32 4294901760, %v3298_v19 }
 0x184   : > { %v3300_v23 = vsub.f32 %v3298_v19, %v3299_v2 }
 0x186   : > { %v3301_v25 = vand.u32 4294901760, %v3300_v23 }
 0x188   : > { %2794 = vmatmul.mubr.f32.vlgmr.msra.gmra.mrb[0].mxu0 %v2793_v52  ;;  %v4174_v52 = vpop.permute.xlu1 %4173 }
 0x189   : > { %2811 = vmatpush1.msra.mxu0 %v2810_v53  ;;  %2874 = vmatprep.mubr.f32.mxu0 %v9476_v0  ;;  %v4172_v53 = vpop.permute.xlu0 %4171 }
 0x18a   : > { %2884 = vmatprep.subr.mxu0 %v2801_v40  ;;  %v4177_v54 = vsel %vm4175_vm9, %v4174_v52, %v4172_v53  ;;  %v4176_v7 = vsel %vm4175_vm9, %v4172_v53, %v4174_v52 }
 0x18b   : > { %v4183_v56 = vsel %vm245_vm12, %v4177_v54, 0.0 }
 0x18c   : > { %v4193_v57 = vsel %vm275_vm8, %v4183_v56, 0 }
 0x18d   : > { %v4195_v58 = vand.u32 4294901760, %v4193_v57 }
 0x18f   : > { %v4274_v62 = vsub.f32 %v4193_v57, %v4195_v58 }
 0x190   : > { %2876 = vmatmul.mubr.f32.vlgmr.msra.gmra.mrb[0].mxu0 %v9818_v41 }
 0x191   : > { %2887 = vmatpush1.msra.mxu0 %v2807_v45  ;;  %2950 = vmatprep.mubr.f32.mxu0 %v9476_v0 }
 0x192   : > { %2960 = vmatprep.subr.mxu0 %v2722_v35 }
 0x198   : > { %2953 = vmatmul.mubr.f32.vlgmr.msra.gmra.mrb[0].mxu0 %v2790_v44 }
 0x199   : > { %2962 = vmatpush1.msra.mxu0 %v2724_v42  ;;  %3025 = vmatprep.mubr.f32.mxu0 %v9476_v0 }
 0x19a   : > { %3038 = vmatprep.subr.mxu0 %v2802_v43 }
 0x1a0   : > { %3029 = vmatmul.mubr.f32.vlgmr.msra.gmra.mrb[0].mxu0 %v2791_v47 }
 0x1a1   : > { %3042 = vmatpush1.msra.mxu0 %v2808_v48  ;;  %3105 = vmatprep.mubr.f32.mxu0 %v9476_v0 }
 0x1a2   : > { %3114 = vmatprep.subr.mxu0 %v2722_v35  ;;  %v3691_v35 = vsel %vm9847_vm11, %v3685_v32, 0.0  ;;  %v4679_v32 = vsel %vm271_vm0, %v4677_v31, 0 }
 0x1a3   : > { %v3699_v37 = vsel %vm275_vm8, %v3691_v35, 0 }
 0x1a4   : > { %v3706_v40 = vand.u32 4294901760, %v3699_v37 }
 0x1a6   : > { %v3789_v43 = vsub.f32 %v3699_v37, %v3706_v40 }
 0x1a8   : > { %3107 = vmatmul.mubr.f32.vlgmr.msra.gmra.mrb[0].mxu0 %v9818_v41  ;;  %v3790_v46 = vand.u32 4294901760, %v3789_v43 }
 0x1a9   : > { %3116 = vmatpush1.msra.mxu0 %v2724_v42  ;;  %3179 = vmatprep.mubr.f32.mxu0 %v9476_v0  ;;  %v3772_v42 = vsub.f32 %v3696_v36, %v9899_v39 }
 0x1aa   : > { %3214 = vmatprep.subr.mxu0 %v3213_v60  ;;  %v3791_v49 = vsub.f32 %v3789_v43, %v3790_v46 }
 0x1ab   : > { %v3773_v45 = vand.u32 4294901760, %v3772_v42 }
 0x1ac   : > { %v3792_v51 = vand.u32 4294901760, %v3791_v49 }
 0x1ad   : > { %v3774_v48 = vsub.f32 %v3772_v42, %v3773_v45 }
 0x1af   : > { %v3775_v50 = vand.u32 4294901760, %v3774_v48 }
 0x1b0   : > { %3181 = vmatmul.mubr.f32.vlgmr.msra.gmra.mrb[0].mxu0 %v9818_v41  ;;  %v3784_v41 = vand.u32 4294901760, %v3783_v38 }
 0x1b1   : > { %3216 = vmatpush1.msra.mxu0 %v3215_v8  ;;  %3279 = vmatprep.mubr.f32.mxu0 %v9476_v0 }
 0x1b2   : > { %3296 = vmatprep.subr.mxu0 %v3295_v9  ;;  %v3785_v44 = vsub.f32 %v3783_v38, %v3784_v41 }
 0x1b4   : > { %v3786_v47 = vand.u32 4294901760, %v3785_v44 }
 0x1b8   : > { %3285 = vmatmul.mubr.f32.vlgmr.msra.gmra.mrb[0].mxu0 %v3284_v24 }
 0x1b9   : > { %3302 = vmatpush1.msra.mxu0 %v3301_v25  ;;  %3365 = vmatprep.mubr.f32.mxu0 %v9476_v0 }
 0x1ba   : > { %3375 = vmatprep.subr.mxu0 %v3292_v3 }
 0x1c0   : > { %3367 = vmatmul.mubr.f32.vlgmr.msra.gmra.mrb[0].mxu0 %v9869_v6 }
 0x1c1   : > { %3378 = vmatpush1.msra.mxu0 %v3298_v19  ;;  %3441 = vmatprep.mubr.f32.mxu0 %v9476_v0 }
 0x1c2   : > { %3451 = vmatprep.subr.mxu0 %v3213_v60 }
 0x1c8   : > { %3444 = vmatmul.mubr.f32.vlgmr.msra.gmra.mrb[0].mxu0 %v3281_v16 }
 0x1c9   : > { %3453 = vmatpush1.msra.mxu0 %v3215_v8  ;;  %3516 = vmatprep.mubr.f32.mxu0 %v9476_v0 }
 0x1ca   : > { %3529 = vmatprep.subr.mxu0 %v3293_v11 }
 0x1d0   : > { %3520 = vmatmul.mubr.f32.vlgmr.msra.gmra.mrb[0].mxu0 %v3282_v21 }
 0x1d1   : > { %3533 = vmatpush1.msra.mxu0 %v3299_v2  ;;  %3596 = vmatprep.mubr.f32.mxu0 %v9476_v0 }
 0x1d2   : > { %3605 = vmatprep.subr.mxu0 %v3213_v60  ;;  %v4182_v60 = vsel %vm244_vm14, %v4176_v7, 0.0 }
 0x1d3   : > { %v4190_v10 = vsel %vm275_vm8, %v4182_v60, 0 }
 0x1d4   : > { %v4197_v3 = vand.u32 4294901760, %v4190_v10 }
 0x1d6   : > { %v4280_v11 = vsub.f32 %v4190_v10, %v4197_v3  ;;  %v9130_v10 = vld [vmem:[%s10241_s3 + $0x4] sm:$0xf] }
 0x1d8   : > { %3598 = vmatmul.mubr.f32.vlgmr.msra.gmra.mrb[0].mxu0 %v9869_v6  ;;  %v4281_v20 = vand.u32 4294901760, %v4280_v11 }
 0x1d9   : > { %3607 = vmatpush1.msra.mxu0 %v3215_v8  ;;  %3670 = vmatprep.mubr.f32.mxu0 %v9476_v0  ;;  %v4263_v8 = vsub.f32 %v4187_v61, %v4262_v63 }
 0x1da   : > { %3705 = vmatprep.subr.mxu0 %v3704_v33  ;;  %v4282_v9 = vsub.f32 %v4280_v11, %v4281_v20  ;;  %v252_v24 = vpop.permute.xlu0 %251 }
 0x1db   : > { %v4264_v19 = vand.u32 4294901760, %v4263_v8 }
 0x1dc   : > { %v4283_v23 = vand.u32 4294901760, %v4282_v9 }
 0x1dd   : > { %v4265_v2 = vsub.f32 %v4263_v8, %v4264_v19 }
 0x1df   : > { %v4266_v22 = vand.u32 4294901760, %v4265_v2 }
 0x1e0   : > { %3672 = vmatmul.mubr.f32.vlgmr.msra.gmra.mrb[0].mxu0 %v9869_v6  ;;  %v4275_v6 = vand.u32 4294901760, %v4274_v62 }
 0x1e1   : > { %3707 = vmatpush1.msra.mxu0 %v3706_v40  ;;  %3770 = vmatprep.mubr.f32.mxu0 %v9476_v0 }
 0x1e2   : > { %3787 = vmatprep.subr.mxu0 %v3786_v47  ;;  %v4276_v16 = vsub.f32 %v4274_v62, %v4275_v6 }
 0x1e4   : > { %v4277_v21 = vand.u32 4294901760, %v4276_v16 }
 0x1e8   : > { %3776 = vmatmul.mubr.f32.vlgmr.msra.gmra.mrb[0].mxu0 %v3775_v50 }
 0x1e9   : > { %3793 = vmatpush1.msra.mxu0 %v3792_v51  ;;  %3856 = vmatprep.mubr.f32.mxu0 %v9476_v0 }
 0x1ea   : > { %3866 = vmatprep.subr.mxu0 %v3783_v38 }
 0x1f0   : > { %3858 = vmatmul.mubr.f32.vlgmr.msra.gmra.mrb[0].mxu0 %v9899_v39 }
 0x1f1   : > { %3869 = vmatpush1.msra.mxu0 %v3789_v43  ;;  %3932 = vmatprep.mubr.f32.mxu0 %v9476_v0 }
 0x1f2   : > { %3942 = vmatprep.subr.mxu0 %v3704_v33 }
 0x1f8   : > { %3935 = vmatmul.mubr.f32.vlgmr.msra.gmra.mrb[0].mxu0 %v3772_v42 }
 0x1f9   : > { %3944 = vmatpush1.msra.mxu0 %v3706_v40  ;;  %4007 = vmatprep.mubr.f32.mxu0 %v9476_v0 }
 0x1fa   : > { %4020 = vmatprep.subr.mxu0 %v3784_v41 }
 0x200   : > { %4011 = vmatmul.mubr.f32.vlgmr.msra.gmra.mrb[0].mxu0 %v3773_v45 }
 0x201   : > { %4024 = vmatpush1.msra.mxu0 %v3790_v46  ;;  %4087 = vmatprep.mubr.f32.mxu0 %v9476_v0 }
 0x202   : > { %4096 = vmatprep.subr.mxu0 %v3704_v33  ;;  %v9992_v33 = vand.u32 4294901760, %v4679_v32 }
 0x204   : > { %v4755_v34 = vsub.f32 %v4679_v32, %v9992_v33 }
 0x206   : > { %v4756_v36 = vand.u32 4294901760, %v4755_v34 }
 0x208   : > { %4089 = vmatmul.mubr.f32.vlgmr.msra.gmra.mrb[0].mxu0 %v9899_v39  ;;  %v4757_v38 = vsub.f32 %v4755_v34, %v4756_v36 }
 0x209   : > { %4098 = vmatpush1.msra.mxu0 %v3706_v40  ;;  %4161 = vmatprep.mubr.f32.mxu0 %v9476_v0 }
 0x20a   : > { %4196 = vmatprep.subr.mxu0 %v4195_v58  ;;  %v4758_v47 = vand.u32 4294901760, %v4757_v38 }
 0x210   : > { %4163 = vmatmul.mubr.f32.vlgmr.msra.gmra.mrb[0].mxu0 %v9899_v39 }
 0x211   : > { %4198 = vmatpush1.msra.mxu0 %v4197_v3  ;;  %4261 = vmatprep.mubr.f32.mxu0 %v9476_v0 }
 0x212   : > { %4278 = vmatprep.subr.mxu0 %v4277_v21 }
 0x218   : > { %4267 = vmatmul.mubr.f32.vlgmr.msra.gmra.mrb[0].mxu0 %v4266_v22 }
 0x219   : > { %4284 = vmatpush1.msra.mxu0 %v4283_v23  ;;  %4347 = vmatprep.mubr.f32.mxu0 %v9476_v0 }
 0x21a   : > { %4357 = vmatprep.subr.mxu0 %v4274_v62 }
 0x220   : > { %4349 = vmatmul.mubr.f32.vlgmr.msra.gmra.mrb[0].mxu0 %v4262_v63 }
 0x221   : > { %4360 = vmatpush1.msra.mxu0 %v4280_v11  ;;  %4423 = vmatprep.mubr.f32.mxu0 %v9476_v0 }
 0x222   : > { %4433 = vmatprep.subr.mxu0 %v4195_v58 }
 0x228   : > { %4426 = vmatmul.mubr.f32.vlgmr.msra.gmra.mrb[0].mxu0 %v4263_v8 }
 0x229   : > { %4435 = vmatpush1.msra.mxu0 %v4197_v3  ;;  %4498 = vmatprep.mubr.f32.mxu0 %v9476_v0 }
 0x22a   : > { %4511 = vmatprep.subr.mxu0 %v4275_v6 }
 0x230   : > { %4502 = vmatmul.mubr.f32.vlgmr.msra.gmra.mrb[0].mxu0 %v4264_v19 }
 0x231   : > { %4515 = vmatpush1.msra.mxu0 %v4281_v20  ;;  %4578 = vmatprep.mubr.f32.mxu0 %v9476_v0 }
 0x232   : > { %4587 = vmatprep.subr.mxu0 %v4195_v58 }
 0x238   : > { %4580 = vmatmul.mubr.f32.vlgmr.msra.gmra.mrb[0].mxu0 %v4262_v63 }
 0x239   : > { %4589 = vmatpush1.msra.mxu0 %v4197_v3  ;;  %4652 = vmatprep.mubr.f32.mxu0 %v9476_v0  ;;  %v5165_v3 = vsel %vm271_vm0, %v9130_v10, 0 }
 0x23a   : > { %v5240_v11 = vand.u32 4294901760, %v5165_v3 }
 0x23c   : > { %v5241_v20 = vsub.f32 %v5165_v3, %v5240_v11 }
 0x23e   : > { %v5242_v9 = vand.u32 4294901760, %v5241_v20 }
 0x240   : > { %4654 = vmatmul.mubr.f32.vlgmr.msra.gmra.mrb[0].mxu0 %v4262_v63 }
 0x313   : > { %v4655_v25 = vpop.f32.mrb[0].mxu0 }
 0x314   : > { %v9145_v26 = vadd.f32 %v4655_v25, %v252_v24  ;;  %v4657_v1 = vpop.f32.mrb[1].mxu0 }
 0x315   : > { %v9146_v28 = vadd.f32 %v4657_v1, %v252_v24  ;;  %v5243_v24 = vsub.f32 %v5241_v20, %v5242_v9 }
 0x316   : > { %v9949_v27 = vmax.f32 %v9145_v26, 0.0 }
 0x317   : > { %v9955_v29 = vmax.f32 %v9146_v28, 0.0  ;;  %v5244_v26 = vand.u32 4294901760, %v5243_v24 }
 0x318   : > { %5154 = vrot.lane.b32.xlu0 %v9949_v27, %s9478_s11  ;;  %4669 = vrot.lane.b32.xlu1 %v9949_v27, %s9477_s10 }
 0x319   : > { %v6621_v24 = vsel %vm275_vm8, %v9955_v29, 0 }
 0x31c   : > { %5640 = vrot.lane.b32.xlu0 %v9949_v27, %s9479_s12  ;;  %4671 = vrot.lane.b32.xlu1 %v9955_v29, %s9477_s10 }
 0x320   : > { %6126 = vrot.lane.b32.xlu0 %v9949_v27, %s9480_s13  ;;  %5156 = vrot.lane.b32.xlu1 %v9955_v29, %s9478_s11 }
 0x324   : > { %7090 = vrot.lane.b32.xlu0 %v9949_v27, %s9481_s16  ;;  %5642 = vrot.lane.b32.xlu1 %v9955_v29, %s9479_s12 }
 0x328   : > { %7576 = vrot.lane.b32.xlu0 %v9949_v27, %s9482_s25  ;;  %6128 = vrot.lane.b32.xlu1 %v9955_v29, %s9480_s13 }
 0x32c   : > { %8062 = vrot.lane.b32.xlu0 %v9949_v27, %s9483_s6  ;;  %7092 = vrot.lane.b32.xlu1 %v9955_v29, %s9481_s16  ;;  %s215_s16 = sand.u32 1, %s9466_s19  }
 0x32d   : > { %s9042_s14 = scalar_lea.sflag [#allocation3], %s215_s16 }
 0x330   : > { %8548 = vrot.lane.b32.xlu0 %v9949_v27, %s9484_s9  ;;  %7578 = vrot.lane.b32.xlu1 %v9955_v29, %s9482_s25  ;;  %s9119_s25 = sshll.u32 %s215_s16, 3 }
 0x334   : > { %4666 = vperm.xlu0 %9410, %v247_v30   ;;  %8064 = vrot.lane.b32.xlu1 %v9955_v29, %s9483_s6  ;;  %s9144_s6 = sshll.u32 %s9538_s22, 7  ;;  %s9486_s22 = smov [#allocation2]  }
 0x335   : > { %s10196_s8 = scalar_lea.hbm %s10243_s5, %s9144_s6  ;;  %s9416_s17 = sshll.u32 %s9486_s22, 4  ;;  %s9417_s17 = int_to_ptr.vmem [resolvable:$false] %s9416_s17 }
 0x336   : > { %s9418_s23 = scalar_lea.vmem %s9417_s17, 256 }
 0x338   : > { %8550 = vrot.lane.b32.xlu1 %v9955_v29, %s9484_s9  ;;  %s217_s9 = scalar_lea.vmem [#allocation2], %s9119_s25 }
 0x339   : > { %s9056_s26 = sshll.u32 %s217_s9, 4  ;;  %s10198_s26 = int_to_ptr.vmem [resolvable:$true] %s9056_s26 }
 0x33a   : > { %s9412_s15 = scalar_lea.vmem %s10198_s26, 128  ;;  %p9419_p0 = scmp.lt.s32.totalorder %s10198_s26, %s9417_s17 }
 0x33b   : > { %p9413_p11 = scmp.ne.s32.totalorder %s10198_s26, %s9412_s15  ;;  %p9420_p1 = scmp.lt.s32.totalorder %s9418_s23, %s9412_s15 }
 0x33d   : > { %p9414_p12 = pnand %p9413_p11, %p9555_p5  ;;  %p9421_p2 = por %p9420_p1, %p9419_p0 }
 0x33f   : > { %p9415_p13 = pneg %p9414_p12 }
 0x341   : > { %p9422_p3 = pnand %p9421_p2, %p9415_p13 }
 0x38a   : > { %v4670_v35 = vpop.permute.xlu1 %4669  ;;  %v5155_v7 = vpop.permute.xlu0 %5154 }
 0x38e   : > { %v4672_v37 = vpop.permute.xlu1 %4671  ;;  %v5641_v30 = vpop.permute.xlu0 %5640 }
 0x38f   : > { %v4673_v39 = vsel %vm261_vm6, %v4670_v35, %v4672_v37  ;;  %v4674_v40 = vsel %vm261_vm6, %v4672_v37, %v4670_v35  ;;  %v9131_v35 = vld [vmem:[%s10241_s3 + $0x8] sm:$0xf] }
 0x390   : > { %v4675_v41 = vsel %vm238_vm5, %v4674_v40, 0.0  ;;  %v4676_v42 = vsel %vm239_vm7, %v4673_v39, 0.0  ;;  %vm10272_vm5 = vcmp.lt.s32.totalorder %v9597_v5, 16  ;;  %vm10274_vm7 = vcmp.lt.s32.totalorder %v9597_v5, 15 }
 0x391   : > { %v4682_v43 = vsel %vm275_vm8, %v4675_v41, 0  ;;  %v4685_v44 = vsel %vm275_vm8, %v4676_v42, 0  ;;  %vm10273_vm6 = vmmov %vm10272_vm5  ;;  %v5651_v37 = vsel %vm271_vm0, %v9131_v35, 0 }
 0x392   : > { %v4687_v45 = vand.u32 4294901760, %v4685_v44  ;;  %v4689_v46 = vand.u32 4294901760, %v4682_v43  ;;  %v5157_v57 = vpop.permute.xlu1 %5156  ;;  %v5726_v40 = vand.u32 4294901760, %v5651_v37 }
 0x393   : > { %v5158_v58 = vsel %vm10272_vm5, %v5155_v7, %v5157_v57  ;;  %v5159_v61 = vsel %vm10273_vm6, %v5157_v57, %v5155_v7  ;;  %vm10275_vm5 = vmand %vm9628_vm3, %vm9704_vm10 }
 0x394   : > { %v4766_v48 = vsub.f32 %v4685_v44, %v4687_v45  ;;  %v4772_v49 = vsub.f32 %v4682_v43, %v4689_v46  ;;  %4688 = vmatprep.subr.mxu1 %v4687_v45  ;;  %v5161_v59 = vsel %vm9628_vm3, %v5158_v58, 0.0  ;;  %v5160_v63 = vsel %vm9616_vm1, %v5159_v61, 0.0  ;;  %vm10276_vm6 = vmmov %vm10274_vm7  ;;  %v9132_v58 = vld [vmem:[%s10241_s3 + $0xc] sm:$0xf] }
 0x395   : > { %4690 = vmatpush1.msra.mxu1 %v4689_v46  ;;  %v5171_v60 = vsel %vm275_vm8, %v5161_v59, 0  ;;  %v5168_v6 = vsel %vm275_vm8, %v5160_v63, 0  ;;  %v5727_v43 = vsub.f32 %v5651_v37, %v5726_v40  ;;  %v6137_v61 = vsel %vm271_vm0, %v9132_v58, 0 }
 0x396   : > { %v4773_v50 = vand.u32 4294901760, %v4772_v49  ;;  %4759 = vmatmul.mubr.f32.vlgmr.msra.gmra.mrb[0].mxu1 %v4758_v47  ;;  %v4767_v51 = vand.u32 4294901760, %v4766_v48  ;;  %v5173_v62 = vand.u32 4294901760, %v5171_v60  ;;  %v5175_v16 = vand.u32 4294901760, %v5168_v6  ;;  %v5643_v28 = vpop.permute.xlu1 %5642 }
 0x397   : > { %4839 = vmatprep.mubr.f32.mxu1 %v9476_v0  ;;  %v5644_v31 = vsel %vm10274_vm7, %v5641_v30, %v5643_v28  ;;  %vm10277_vm7 = vmand %vm9616_vm1, %vm9723_vm13  ;;  %vm10278_vm1 = vcmp.lt.s32.totalorder %v9597_v5, 1  ;;  %v6212_v63 = vand.u32 4294901760, %v6137_v61 }
 0x398   : > { %v4768_v52 = vsub.f32 %v4766_v48, %v4767_v51  ;;  %v4774_v53 = vsub.f32 %v4772_v49, %v4773_v50  ;;  %v5252_v8 = vsub.f32 %v5171_v60, %v5173_v62  ;;  %v5258_v21 = vsub.f32 %v5168_v6, %v5175_v16  ;;  %vm10279_vm3 = vmmov %vm10278_vm1 }
 0x399   : > { %v5647_v32 = vsel %vm10275_vm5, %v5644_v31, 0.0  ;;  %vm10280_vm5 = vcmp.lt.s32.totalorder %v9597_v5, 127 }
 0x39a   : > { %v4769_v54 = vand.u32 4294901760, %v4768_v52  ;;  %v4775_v56 = vand.u32 4294901760, %v4774_v53  ;;  %v5253_v19 = vand.u32 4294901760, %v5252_v8  ;;  %v5259_v22 = vand.u32 4294901760, %v5258_v21  ;;  %v6129_v52 = vpop.permute.xlu1 %6128  ;;  %v6127_v53 = vpop.permute.xlu0 %6126 }
 0x39b   : > { %v6131_v7 = vsel %vm10279_vm3, %v6129_v52, %v6127_v53 }
 0x39c   : > { %4770 = vmatprep.subr.mxu1 %v4769_v54  ;;  %v5254_v2 = vsub.f32 %v5252_v8, %v5253_v19  ;;  %v5260_v25 = vsub.f32 %v5258_v21, %v5259_v22  ;;  %v6130_v54 = vsel %vm10278_vm1, %v6127_v53, %v6129_v52  ;;  %v6132_v60 = vsel %vm9622_vm2, %v6131_v7, 0.0  ;;  %vm10283_vm1 = vmand %vm9828_vm15, %vm9634_vm4 }
 0x39d   : > { %4776 = vmatpush1.msra.mxu1 %v4775_v56  ;;  %v6133_v56 = vsel %vm9634_vm4, %v6130_v54, 0.0  ;;  %v6140_v10 = vsel %vm275_vm8, %v6132_v60, 0 }
 0x39e   : > { %4841 = vmatmul.mubr.f32.vlgmr.msra.gmra.mrb[0].mxu1 %v9992_v33  ;;  %4849 = vmatprep.subr.mxu1 %v4766_v48  ;;  %v5255_v23 = vand.u32 4294901760, %v5254_v2  ;;  %v5261_v1 = vand.u32 4294901760, %v5260_v25  ;;  %v6143_v57 = vsel %vm275_vm8, %v6133_v56, 0  ;;  %v6147_v3 = vand.u32 4294901760, %v6140_v10  ;;  %v9133_v25 = vld [vmem:[%s10241_s3 + $0x10] sm:$0xf] }
 0x39f   : > { %4852 = vmatpush1.msra.mxu1 %v4772_v49  ;;  %4915 = vmatprep.mubr.f32.mxu1 %v9476_v0  ;;  %v6145_v59 = vand.u32 4294901760, %v6143_v57 }
 0x3a0   : > { %4925 = vmatprep.subr.mxu1 %v4687_v45 }
 0x3a6   : > { %4918 = vmatmul.mubr.f32.vlgmr.msra.gmra.mrb[0].mxu1 %v4755_v34  ;;  %v5645_v34 = vsel %vm10276_vm6, %v5643_v28, %v5641_v30  ;;  %v6618_v28 = vsel %vm275_vm8, %v9949_v27, 0  ;;  %vm10281_vm6 = vmmov %vm10280_vm5 }
 0x3a7   : > { %4927 = vmatpush1.msra.mxu1 %v4689_v46  ;;  %4990 = vmatprep.mubr.f32.mxu1 %v9476_v0  ;;  %v5646_v17 = vsel %vm10277_vm7, %v5645_v34, 0.0  ;;  %vm10282_vm7 = vcmp.lt.s32.totalorder %v9597_v5, 113 }
 0x3a8   : > { %5003 = vmatprep.subr.mxu1 %v4767_v51  ;;  %v5654_v38 = vsel %vm275_vm8, %v5646_v17, 0  ;;  %vm10284_vm3 = vmmov %vm10282_vm7 }
 0x3a9   : > { %v5661_v41 = vand.u32 4294901760, %v5654_v38 }
 0x3ab   : > { %v5744_v14 = vsub.f32 %v5654_v38, %v5661_v41 }
 0x3ae   : > { %4994 = vmatmul.mubr.f32.vlgmr.msra.gmra.mrb[0].mxu1 %v4756_v36 }
 0x3af   : > { %5007 = vmatpush1.msra.mxu1 %v4773_v50  ;;  %5070 = vmatprep.mubr.f32.mxu1 %v9476_v0 }
 0x3b0   : > { %5079 = vmatprep.subr.mxu1 %v4687_v45  ;;  %v5728_v45 = vand.u32 4294901760, %v5727_v43 }
 0x3b2   : > { %v5729_v48 = vsub.f32 %v5727_v43, %v5728_v45 }
 0x3b4   : > { %v5730_v50 = vand.u32 4294901760, %v5729_v48 }
 0x3b6   : > { %5072 = vmatmul.mubr.f32.vlgmr.msra.gmra.mrb[0].mxu1 %v9992_v33 }
 0x3b7   : > { %5081 = vmatpush1.msra.mxu1 %v4689_v46  ;;  %5144 = vmatprep.mubr.f32.mxu1 %v9476_v0  ;;  %v5745_v46 = vand.u32 4294901760, %v5744_v14 }
 0x3b8   : > { %5174 = vmatprep.subr.mxu1 %v5173_v62 }
 0x3b9   : > { %v5746_v49 = vsub.f32 %v5744_v14, %v5745_v46 }
 0x3bb   : > { %v5747_v51 = vand.u32 4294901760, %v5746_v49 }
 0x3be   : > { %5146 = vmatmul.mubr.f32.vlgmr.msra.gmra.mrb[0].mxu1 %v9992_v33  ;;  %v5657_v33 = vsel %vm275_vm8, %v5647_v32, 0  ;;  %v6625_v32 = vand.u32 4294901760, %v6618_v28 }
 0x3bf   : > { %5176 = vmatpush1.msra.mxu1 %v5175_v16  ;;  %5239 = vmatprep.mubr.f32.mxu1 %v9476_v0  ;;  %v5659_v36 = vand.u32 4294901760, %v5657_v33 }
 0x3c0   : > { %5256 = vmatprep.subr.mxu1 %v5255_v23  ;;  %v6708_v34 = vsub.f32 %v6618_v28, %v6625_v32 }
 0x3c1   : > { %v5738_v39 = vsub.f32 %v5657_v33, %v5659_v36 }
 0x3c2   : > { %v6709_v17 = vand.u32 4294901760, %v6708_v34 }
 0x3c3   : > { %v5739_v42 = vand.u32 4294901760, %v5738_v39 }
 0x3c4   : > { %v6710_v27 = vsub.f32 %v6708_v34, %v6709_v17 }
 0x3c5   : > { %v5740_v44 = vsub.f32 %v5738_v39, %v5739_v42 }
 0x3c6   : > { %5245 = vmatmul.mubr.f32.vlgmr.msra.gmra.mrb[0].mxu1 %v5244_v26  ;;  %v6623_v26 = vand.u32 4294901760, %v6621_v24 }
 0x3c7   : > { %5262 = vmatpush1.msra.mxu1 %v5261_v1  ;;  %5325 = vmatprep.mubr.f32.mxu1 %v9476_v0  ;;  %v5741_v47 = vand.u32 4294901760, %v5740_v44  ;;  %v6615_v1 = vsel %vm271_vm0, %v9133_v25, 0 }
 0x3c8   : > { %5335 = vmatprep.subr.mxu1 %v5252_v8  ;;  %v6213_v8 = vsub.f32 %v6137_v61, %v6212_v63  ;;  %v6702_v30 = vsub.f32 %v6621_v24, %v6623_v26  ;;  %v6690_v31 = vand.u32 4294901760, %v6615_v1 }
 0x3ca   : > { %v6703_v29 = vand.u32 4294901760, %v6702_v30  ;;  %v6691_v33 = vsub.f32 %v6615_v1, %v6690_v31 }
 0x3cc   : > { %v6704_v35 = vsub.f32 %v6702_v30, %v6703_v29 }
 0x3ce   : > { %5327 = vmatmul.mubr.f32.vlgmr.msra.gmra.mrb[0].mxu1 %v5240_v11  ;;  %v6705_v37 = vand.u32 4294901760, %v6704_v35 }
 0x3cf   : > { %5338 = vmatpush1.msra.mxu1 %v5258_v21  ;;  %5401 = vmatprep.mubr.f32.mxu1 %v9476_v0 }
 0x3d0   : > { %5411 = vmatprep.subr.mxu1 %v5173_v62 }
 0x3d6   : > { %5404 = vmatmul.mubr.f32.vlgmr.msra.gmra.mrb[0].mxu1 %v5241_v20 }
 0x3d7   : > { %5413 = vmatpush1.msra.mxu1 %v5175_v16  ;;  %5476 = vmatprep.mubr.f32.mxu1 %v9476_v0 }
 0x3d8   : > { %5489 = vmatprep.subr.mxu1 %v5253_v19  ;;  %v6214_v19 = vand.u32 4294901760, %v6213_v8 }
 0x3da   : > { %v6215_v2 = vsub.f32 %v6213_v8, %v6214_v19 }
 0x3de   : > { %5480 = vmatmul.mubr.f32.vlgmr.msra.gmra.mrb[0].mxu1 %v5242_v9 }
 0x3df   : > { %5493 = vmatpush1.msra.mxu1 %v5259_v22  ;;  %5556 = vmatprep.mubr.f32.mxu1 %v9476_v0  ;;  %v6216_v22 = vand.u32 4294901760, %v6215_v2 }
 0x3e0   : > { %5565 = vmatprep.subr.mxu1 %v5173_v62  ;;  %v6224_v62 = vsub.f32 %v6143_v57, %v6145_v59 }
 0x3e2   : > { %v6225_v6 = vand.u32 4294901760, %v6224_v62 }
 0x3e6   : > { %5558 = vmatmul.mubr.f32.vlgmr.msra.gmra.mrb[0].mxu1 %v5240_v11 }
 0x3e7   : > { %5567 = vmatpush1.msra.mxu1 %v5175_v16  ;;  %5630 = vmatprep.mubr.f32.mxu1 %v9476_v0  ;;  %v6226_v16 = vsub.f32 %v6224_v62, %v6225_v6 }
 0x3e8   : > { %5660 = vmatprep.subr.mxu1 %v5659_v36 }
 0x3e9   : > { %v6227_v21 = vand.u32 4294901760, %v6226_v16 }
 0x3ee   : > { %5632 = vmatmul.mubr.f32.vlgmr.msra.gmra.mrb[0].mxu1 %v5240_v11  ;;  %v6230_v11 = vsub.f32 %v6140_v10, %v6147_v3 }
 0x3ef   : > { %5662 = vmatpush1.msra.mxu1 %v5661_v41  ;;  %5725 = vmatprep.mubr.f32.mxu1 %v9476_v0 }
 0x3f0   : > { %5742 = vmatprep.subr.mxu1 %v5741_v47  ;;  %v6231_v20 = vand.u32 4294901760, %v6230_v11 }
 0x3f2   : > { %v6232_v9 = vsub.f32 %v6230_v11, %v6231_v20 }
 0x3f4   : > { %v6233_v23 = vand.u32 4294901760, %v6232_v9 }
 0x3f6   : > { %5731 = vmatmul.mubr.f32.vlgmr.msra.gmra.mrb[0].mxu1 %v5730_v50 }
 0x3f7   : > { %5748 = vmatpush1.msra.mxu1 %v5747_v51  ;;  %5811 = vmatprep.mubr.f32.mxu1 %v9476_v0 }
 0x3f8   : > { %5821 = vmatprep.subr.mxu1 %v5738_v39 }
 0x3fe   : > { %5813 = vmatmul.mubr.f32.vlgmr.msra.gmra.mrb[0].mxu1 %v5726_v40 }
 0x3ff   : > { %5824 = vmatpush1.msra.mxu1 %v5744_v14  ;;  %5887 = vmatprep.mubr.f32.mxu1 %v9476_v0 }
 0x400   : > { %5897 = vmatprep.subr.mxu1 %v5659_v36 }
 0x406   : > { %5890 = vmatmul.mubr.f32.vlgmr.msra.gmra.mrb[0].mxu1 %v5727_v43 }
 0x407   : > { %5899 = vmatpush1.msra.mxu1 %v5661_v41  ;;  %5962 = vmatprep.mubr.f32.mxu1 %v9476_v0 }
 0x408   : > { %5975 = vmatprep.subr.mxu1 %v5739_v42  ;;  %v7091_v42 = vpop.permute.xlu0 %7090 }
 0x40e   : > { %5966 = vmatmul.mubr.f32.vlgmr.msra.gmra.mrb[0].mxu1 %v5728_v45 }
 0x40f   : > { %5979 = vmatpush1.msra.mxu1 %v5745_v46  ;;  %6042 = vmatprep.mubr.f32.mxu1 %v9476_v0  ;;  %v9134_v46 = vld [vmem:[%s10241_s3 + $0x14] sm:$0xf] }
 0x410   : > { %6051 = vmatprep.subr.mxu1 %v5659_v36  ;;  %v6692_v36 = vand.u32 4294901760, %v6691_v33  ;;  %v7101_v49 = vsel %vm271_vm0, %v9134_v46, 0 }
 0x411   : > { %v7176_v52 = vand.u32 4294901760, %v7101_v49 }
 0x412   : > { %v6693_v38 = vsub.f32 %v6691_v33, %v6692_v36 }
 0x413   : > { %v7177_v56 = vsub.f32 %v7101_v49, %v7176_v52 }
 0x414   : > { %v6694_v39 = vand.u32 4294901760, %v6693_v38 }
 0x415   : > { %v7178_v58 = vand.u32 4294901760, %v7177_v56 }
 0x416   : > { %6044 = vmatmul.mubr.f32.vlgmr.msra.gmra.mrb[0].mxu1 %v5726_v40 }
 0x417   : > { %6053 = vmatpush1.msra.mxu1 %v5661_v41  ;;  %6116 = vmatprep.mubr.f32.mxu1 %v9476_v0  ;;  %v7093_v41 = vpop.permute.xlu1 %7092  ;;  %v7179_v61 = vsub.f32 %v7177_v56, %v7178_v58 }
 0x418   : > { %6146 = vmatprep.subr.mxu1 %v6145_v59  ;;  %v7095_v43 = vsel %vm10280_vm5, %v7093_v41, %v7091_v42  ;;  %v7094_v45 = vsel %vm10281_vm6, %v7091_v42, %v7093_v41  ;;  %vm10285_vm5 = vmand %vm9847_vm11, %vm9622_vm2  ;;  %vm10286_vm2 = vcmp.lt.s32.totalorder %v9597_v5, 112 }
 0x419   : > { %v7097_v14 = vsel %vm9704_vm10, %v7095_v43, 0.0  ;;  %v7096_v48 = vsel %vm9723_vm13, %v7094_v45, 0.0  ;;  %vm10287_vm4 = vmmov %vm10286_vm2 }
 0x41a   : > { %v7107_v44 = vsel %vm275_vm8, %v7097_v14, 0  ;;  %v7104_v50 = vsel %vm275_vm8, %v7096_v48, 0 }
 0x41b   : > { %v7109_v47 = vand.u32 4294901760, %v7107_v44  ;;  %v7111_v53 = vand.u32 4294901760, %v7104_v50 }
 0x41d   : > { %v7188_v51 = vsub.f32 %v7107_v44, %v7109_v47  ;;  %v7194_v57 = vsub.f32 %v7104_v50, %v7111_v53 }
 0x41e   : > { %6118 = vmatmul.mubr.f32.vlgmr.msra.gmra.mrb[0].mxu1 %v5726_v40  ;;  %v6711_v40 = vand.u32 4294901760, %v6710_v27 }
 0x41f   : > { %6148 = vmatpush1.msra.mxu1 %v6147_v3  ;;  %6211 = vmatprep.mubr.f32.mxu1 %v9476_v0  ;;  %v7189_v54 = vand.u32 4294901760, %v7188_v51 }
 0x420   : > { %6228 = vmatprep.subr.mxu1 %v6227_v21 }
 0x421   : > { %v7190_v7 = vsub.f32 %v7188_v51, %v7189_v54 }
 0x423   : > { %v7191_v60 = vand.u32 4294901760, %v7190_v7 }
 0x426   : > { %6217 = vmatmul.mubr.f32.vlgmr.msra.gmra.mrb[0].mxu1 %v6216_v22 }
 0x427   : > { %6234 = vmatpush1.msra.mxu1 %v6233_v23  ;;  %6297 = vmatprep.mubr.f32.mxu1 %v9476_v0 }
 0x428   : > { %6307 = vmatprep.subr.mxu1 %v6224_v62  ;;  %v7180_v62 = vand.u32 4294901760, %v7179_v61 }
 0x42e   : > { %6299 = vmatmul.mubr.f32.vlgmr.msra.gmra.mrb[0].mxu1 %v6212_v63 }
 0x42f   : > { %6310 = vmatpush1.msra.mxu1 %v6230_v11  ;;  %6373 = vmatprep.mubr.f32.mxu1 %v9476_v0 }
 0x430   : > { %6383 = vmatprep.subr.mxu1 %v6145_v59 }
 0x436   : > { %6376 = vmatmul.mubr.f32.vlgmr.msra.gmra.mrb[0].mxu1 %v6213_v8 }
 0x437   : > { %6385 = vmatpush1.msra.mxu1 %v6147_v3  ;;  %6448 = vmatprep.mubr.f32.mxu1 %v9476_v0 }
 0x438   : > { %6461 = vmatprep.subr.mxu1 %v6225_v6  ;;  %v7577_v6 = vpop.permute.xlu0 %7576 }
 0x43e   : > { %6452 = vmatmul.mubr.f32.vlgmr.msra.gmra.mrb[0].mxu1 %v6214_v19 }
 0x43f   : > { %6465 = vmatpush1.msra.mxu1 %v6231_v20  ;;  %6528 = vmatprep.mubr.f32.mxu1 %v9476_v0  ;;  %v9135_v20 = vld [vmem:[%s10241_s3 + $0x18] sm:$0xf] }
 0x440   : > { %6537 = vmatprep.subr.mxu1 %v6145_v59  ;;  %v7195_v59 = vand.u32 4294901760, %v7194_v57  ;;  %v7587_v2 = vsel %vm271_vm0, %v9135_v20, 0 }
 0x441   : > { %v7662_v23 = vand.u32 4294901760, %v7587_v2 }
 0x442   : > { %v7196_v10 = vsub.f32 %v7194_v57, %v7195_v59 }
 0x446   : > { %6530 = vmatmul.mubr.f32.vlgmr.msra.gmra.mrb[0].mxu1 %v6212_v63 }
 0x447   : > { %6539 = vmatpush1.msra.mxu1 %v6147_v3  ;;  %6602 = vmatprep.mubr.f32.mxu1 %v9476_v0  ;;  %v7579_v3 = vpop.permute.xlu1 %7578 }
 0x448   : > { %6624 = vmatprep.subr.mxu1 %v6623_v26  ;;  %v7581_v8 = vsel %vm10282_vm7, %v7579_v3, %v7577_v6  ;;  %v7580_v19 = vsel %vm10284_vm3, %v7577_v6, %v7579_v3 }
 0x449   : > { %v7583_v11 = vsel %vm10283_vm1, %v7581_v8, 0.0  ;;  %v7582_v18 = vsel %vm10285_vm5, %v7580_v19, 0.0 }
 0x44a   : > { %v7593_v16 = vsel %vm275_vm8, %v7583_v11, 0  ;;  %v7590_v9 = vsel %vm275_vm8, %v7582_v18, 0 }
 0x44b   : > { %v7595_v21 = vand.u32 4294901760, %v7593_v16  ;;  %v7597_v24 = vand.u32 4294901760, %v7590_v9  ;;  %v8065_v35 = vpop.permute.xlu1 %8064 }
 0x44d   : > { %v7674_v22 = vsub.f32 %v7593_v16, %v7595_v21  ;;  %v7680_v15 = vsub.f32 %v7590_v9, %v7597_v24 }
 0x44e   : > { %6604 = vmatmul.mubr.f32.vlgmr.msra.gmra.mrb[0].mxu1 %v6212_v63  ;;  %v7197_v63 = vand.u32 4294901760, %v7196_v10 }
 0x44f   : > { %6626 = vmatpush1.msra.mxu1 %v6625_v32  ;;  %6689 = vmatprep.mubr.f32.mxu1 %v9476_v0  ;;  %v7675_v25 = vand.u32 4294901760, %v7674_v22  ;;  %v8551_v7 = vpop.permute.xlu1 %8550 }
 0x450   : > { %6706 = vmatprep.subr.mxu1 %v6705_v37 }
 0x451   : > { %v7676_v1 = vsub.f32 %v7674_v22, %v7675_v25 }
 0x456   : > { %6695 = vmatmul.mubr.f32.vlgmr.msra.gmra.mrb[0].mxu1 %v6694_v39  ;;  %v9136_v39 = vld [vmem:[%s10241_s3 + $0x1c] sm:$0xf] }
 0x457   : > { %6712 = vmatpush1.msra.mxu1 %v6711_v40  ;;  %6775 = vmatprep.mubr.f32.mxu1 %v9476_v0  ;;  %v8073_v42 = vsel %vm271_vm0, %v9136_v39, 0 }
 0x458   : > { %6785 = vmatprep.subr.mxu1 %v6702_v30  ;;  %v7681_v30 = vand.u32 4294901760, %v7680_v15  ;;  %v8148_v44 = vand.u32 4294901760, %v8073_v42 }
 0x45e   : > { %6777 = vmatmul.mubr.f32.vlgmr.msra.gmra.mrb[0].mxu1 %v6690_v31 }
 0x45f   : > { %6788 = vmatpush1.msra.mxu1 %v6708_v34  ;;  %6851 = vmatprep.mubr.f32.mxu1 %v9476_v0 }
 0x460   : > { %6861 = vmatprep.subr.mxu1 %v6623_v26 }
 0x466   : > { %6854 = vmatmul.mubr.f32.vlgmr.msra.gmra.mrb[0].mxu1 %v6691_v33 }
 0x467   : > { %6863 = vmatpush1.msra.mxu1 %v6625_v32  ;;  %6926 = vmatprep.mubr.f32.mxu1 %v9476_v0 }
 0x468   : > { %6939 = vmatprep.subr.mxu1 %v6703_v29  ;;  %v7682_v29 = vsub.f32 %v7680_v15, %v7681_v30 }
 0x46a   : > { %v7683_v34 = vand.u32 4294901760, %v7682_v29 }
 0x46e   : > { %6930 = vmatmul.mubr.f32.vlgmr.msra.gmra.mrb[0].mxu1 %v6692_v36  ;;  %v8063_v36 = vpop.permute.xlu0 %8062 }
 0x46f   : > { %6943 = vmatpush1.msra.mxu1 %v6709_v17  ;;  %7006 = vmatprep.mubr.f32.mxu1 %v9476_v0  ;;  %v8067_v17 = vsel %vm10286_vm2, %v8065_v35, %v8063_v36  ;;  %v8066_v27 = vsel %vm10287_vm4, %v8063_v36, %v8065_v35 }
 0x470   : > { %7015 = vmatprep.subr.mxu1 %v6623_v26  ;;  %v7663_v26 = vsub.f32 %v7587_v2, %v7662_v23  ;;  %v8069_v37 = vsel %vm9828_vm15, %v8067_v17, 0.0  ;;  %v8068_v41 = vsel %vm9847_vm11, %v8066_v27, 0.0 }
 0x471   : > { %v8079_v38 = vsel %vm275_vm8, %v8069_v37, 0  ;;  %v8076_v43 = vsel %vm275_vm8, %v8068_v41, 0 }
 0x472   : > { %v7664_v28 = vand.u32 4294901760, %v7663_v26  ;;  %v8081_v40 = vand.u32 4294901760, %v8079_v38  ;;  %v8083_v45 = vand.u32 4294901760, %v8076_v43 }
 0x474   : > { %v8160_v14 = vsub.f32 %v8079_v38, %v8081_v40  ;;  %v8166_v48 = vsub.f32 %v8076_v43, %v8083_v45 }
 0x476   : > { %7008 = vmatmul.mubr.f32.vlgmr.msra.gmra.mrb[0].mxu1 %v6690_v31  ;;  %v8161_v46 = vand.u32 4294901760, %v8160_v14 }
 0x477   : > { %7017 = vmatpush1.msra.mxu1 %v6625_v32  ;;  %7080 = vmatprep.mubr.f32.mxu1 %v9476_v0  ;;  %v7665_v32 = vsub.f32 %v7663_v26, %v7664_v28 }
 0x478   : > { %7110 = vmatprep.subr.mxu1 %v7109_v47  ;;  %v8162_v49 = vsub.f32 %v8160_v14, %v8161_v46 }
 0x479   : > { %v7666_v33 = vand.u32 4294901760, %v7665_v32 }
 0x47e   : > { %7082 = vmatmul.mubr.f32.vlgmr.msra.gmra.mrb[0].mxu1 %v6690_v31  ;;  %v7677_v31 = vand.u32 4294901760, %v7676_v1 }
 0x47f   : > { %7112 = vmatpush1.msra.mxu1 %v7111_v53  ;;  %7175 = vmatprep.mubr.f32.mxu1 %v9476_v0 }
 0x480   : > { %7192 = vmatprep.subr.mxu1 %v7191_v60 }
 0x486   : > { %7181 = vmatmul.mubr.f32.vlgmr.msra.gmra.mrb[0].mxu1 %v7180_v62  ;;  %v9137_v62 = vld [vmem:[%s10241_s3 + $0x20] sm:$0xf] }
 0x487   : > { %7198 = vmatpush1.msra.mxu1 %v7197_v63  ;;  %7261 = vmatprep.mubr.f32.mxu1 %v9476_v0  ;;  %v8559_v55 = vsel %vm271_vm0, %v9137_v62, 0 }
 0x488   : > { %7271 = vmatprep.subr.mxu1 %v7188_v51  ;;  %v8167_v51 = vand.u32 4294901760, %v8166_v48  ;;  %v8634_v6 = vand.u32 4294901760, %v8559_v55 }
 0x48a   : > { %v8635_v16 = vsub.f32 %v8559_v55, %v8634_v6 }
 0x48c   : > { %v8636_v19 = vand.u32 4294901760, %v8635_v16 }
 0x48e   : > { %7263 = vmatmul.mubr.f32.vlgmr.msra.gmra.mrb[0].mxu1 %v7176_v52  ;;  %v8637_v18 = vsub.f32 %v8635_v16, %v8636_v19 }
 0x48f   : > { %7274 = vmatpush1.msra.mxu1 %v7194_v57  ;;  %7337 = vmatprep.mubr.f32.mxu1 %v9476_v0 }
 0x490   : > { %7347 = vmatprep.subr.mxu1 %v7109_v47  ;;  %v8638_v9 = vand.u32 4294901760, %v8637_v18 }
 0x496   : > { %7340 = vmatmul.mubr.f32.vlgmr.msra.gmra.mrb[0].mxu1 %v7177_v56 }
 0x497   : > { %7349 = vmatpush1.msra.mxu1 %v7111_v53  ;;  %7412 = vmatprep.mubr.f32.mxu1 %v9476_v0 }
 0x498   : > { %7425 = vmatprep.subr.mxu1 %v7189_v54  ;;  %v8168_v54 = vsub.f32 %v8166_v48, %v8167_v51 }
 0x49a   : > { %v8169_v57 = vand.u32 4294901760, %v8168_v54 }
 0x49e   : > { %7416 = vmatmul.mubr.f32.vlgmr.msra.gmra.mrb[0].mxu1 %v7178_v58  ;;  %v8549_v58 = vpop.permute.xlu0 %8548 }
 0x49f   : > { %7429 = vmatpush1.msra.mxu1 %v7195_v59  ;;  %7492 = vmatprep.mubr.f32.mxu1 %v9476_v0  ;;  %v8553_v59 = vsel %vm4175_vm9, %v8551_v7, %v8549_v58  ;;  %v8552_v10 = vsel %vm4175_vm9, %v8549_v58, %v8551_v7 }
 0x4a0   : > { %7501 = vmatprep.subr.mxu1 %v7109_v47  ;;  %v8149_v47 = vsub.f32 %v8073_v42, %v8148_v44  ;;  %v8555_v60 = vsel %vm245_vm12, %v8553_v59, 0.0  ;;  %v8554_v4 = vsel %vm244_vm14, %v8552_v10, 0.0 }
 0x4a1   : > { %v8565_v61 = vsel %vm275_vm8, %v8555_v60, 0  ;;  %v8562_v5 = vsel %vm275_vm8, %v8554_v4, 0 }
 0x4a2   : > { %v8150_v50 = vand.u32 4294901760, %v8149_v47  ;;  %v8567_v63 = vand.u32 4294901760, %v8565_v61  ;;  %v8569_v8 = vand.u32 4294901760, %v8562_v5 }
 0x4a4   : > { %v8646_v3 = vsub.f32 %v8565_v61, %v8567_v63  ;;  %v8652_v13 = vsub.f32 %v8562_v5, %v8569_v8 }
 0x4a6   : > { %7494 = vmatmul.mubr.f32.vlgmr.msra.gmra.mrb[0].mxu1 %v7176_v52  ;;  %v8647_v11 = vand.u32 4294901760, %v8646_v3  ;;  %v8653_v20 = vand.u32 4294901760, %v8652_v13 }
 0x4a7   : > { %7503 = vmatpush1.msra.mxu1 %v7111_v53  ;;  %7566 = vmatprep.mubr.f32.mxu1 %v9476_v0  ;;  %v8151_v53 = vsub.f32 %v8149_v47, %v8150_v50 }
 0x4a8   : > { %7596 = vmatprep.subr.mxu1 %v7595_v21  ;;  %v8648_v12 = vsub.f32 %v8646_v3, %v8647_v11  ;;  %v8654_v2 = vsub.f32 %v8652_v13, %v8653_v20 }
 0x4a9   : > { %v8152_v56 = vand.u32 4294901760, %v8151_v53 }
 0x4ae   : > { %7568 = vmatmul.mubr.f32.vlgmr.msra.gmra.mrb[0].mxu1 %v7176_v52  ;;  %v8163_v52 = vand.u32 4294901760, %v8162_v49 }
 0x4af   : > { %7598 = vmatpush1.msra.mxu1 %v7597_v24  ;;  %7661 = vmatprep.mubr.f32.mxu1 %v9476_v0 }
 0x4b0   : > { %7678 = vmatprep.subr.mxu1 %v7677_v31 }
 0x4b6   : > { %7667 = vmatmul.mubr.f32.vlgmr.msra.gmra.mrb[0].mxu1 %v7666_v33 }
 0x4b7   : > { %7684 = vmatpush1.msra.mxu1 %v7683_v34  ;;  %7747 = vmatprep.mubr.f32.mxu1 %v9476_v0 }
 0x4b8   : > { %7757 = vmatprep.subr.mxu1 %v7674_v22  ;;  %v8655_v22 = vand.u32 4294901760, %v8654_v2 }
 0x4be   : > { %7749 = vmatmul.mubr.f32.vlgmr.msra.gmra.mrb[0].mxu1 %v7662_v23 }
 0x4bf   : > { %7760 = vmatpush1.msra.mxu1 %v7680_v15  ;;  %7823 = vmatprep.mubr.f32.mxu1 %v9476_v0 }
 0x4c0   : > { %7833 = vmatprep.subr.mxu1 %v7595_v21 }
 0x4c6   : > { %7826 = vmatmul.mubr.f32.vlgmr.msra.gmra.mrb[0].mxu1 %v7663_v26 }
 0x4c7   : > { %7835 = vmatpush1.msra.mxu1 %v7597_v24  ;;  %7898 = vmatprep.mubr.f32.mxu1 %v9476_v0 }
 0x4c8   : > { %7911 = vmatprep.subr.mxu1 %v7675_v25 }
 0x4ce   : > { %7902 = vmatmul.mubr.f32.vlgmr.msra.gmra.mrb[0].mxu1 %v7664_v28 }
 0x4cf   : > { %7915 = vmatpush1.msra.mxu1 %v7681_v30  ;;  %7978 = vmatprep.mubr.f32.mxu1 %v9476_v0 }
 0x4d0   : > { %7987 = vmatprep.subr.mxu1 %v7595_v21  ;;  %v8649_v21 = vand.u32 4294901760, %v8648_v12 }
 0x4d6   : > { %7980 = vmatmul.mubr.f32.vlgmr.msra.gmra.mrb[0].mxu1 %v7662_v23 }
 0x4d7   : > { %7989 = vmatpush1.msra.mxu1 %v7597_v24  ;;  %8052 = vmatprep.mubr.f32.mxu1 %v9476_v0 }
 0x4d8   : > { %8082 = vmatprep.subr.mxu1 %v8081_v40 }
 0x4de   : > { %8054 = vmatmul.mubr.f32.vlgmr.msra.gmra.mrb[0].mxu1 %v7662_v23  ;;  %v4667_v23 = vpop.permute.xlu0 %4666 }
 0x4df   : > { %8084 = vmatpush1.msra.mxu1 %v8083_v45  ;;  %8147 = vmatprep.mubr.f32.mxu1 %v9476_v0 }
 0x4e0   : > { %8164 = vmatprep.subr.mxu1 %v8163_v52 }
 0x4e6   : > { %8153 = vmatmul.mubr.f32.vlgmr.msra.gmra.mrb[0].mxu1 %v8152_v56 }
 0x4e7   : > { %8170 = vmatpush1.msra.mxu1 %v8169_v57  ;;  %8233 = vmatprep.mubr.f32.mxu1 %v9476_v0 }
 0x4e8   : > { %8243 = vmatprep.subr.mxu1 %v8160_v14 }
 0x4ee   : > { %8235 = vmatmul.mubr.f32.vlgmr.msra.gmra.mrb[0].mxu1 %v8148_v44 }
 0x4ef   : > { %8246 = vmatpush1.msra.mxu1 %v8166_v48  ;;  %8309 = vmatprep.mubr.f32.mxu1 %v9476_v0 }
 0x4f0   : > { %8319 = vmatprep.subr.mxu1 %v8081_v40 }
 0x4f6   : > { %8312 = vmatmul.mubr.f32.vlgmr.msra.gmra.mrb[0].mxu1 %v8149_v47 }
 0x4f7   : > { %8321 = vmatpush1.msra.mxu1 %v8083_v45  ;;  %8384 = vmatprep.mubr.f32.mxu1 %v9476_v0 }
 0x4f8   : > { %8397 = vmatprep.subr.mxu1 %v8161_v46 }
 0x4fe   : > { %8388 = vmatmul.mubr.f32.vlgmr.msra.gmra.mrb[0].mxu1 %v8150_v50 }
 0x4ff   : > { %8401 = vmatpush1.msra.mxu1 %v8167_v51  ;;  %8464 = vmatprep.mubr.f32.mxu1 %v9476_v0 }
 0x500   : > { %8473 = vmatprep.subr.mxu1 %v8081_v40 }
 0x506   : > { %8466 = vmatmul.mubr.f32.vlgmr.msra.gmra.mrb[0].mxu1 %v8148_v44 }
 0x507   : > { %8475 = vmatpush1.msra.mxu1 %v8083_v45  ;;  %8538 = vmatprep.mubr.f32.mxu1 %v9476_v0 }
 0x508   : > { %8568 = vmatprep.subr.mxu1 %v8567_v63 }
 0x50e   : > { %8540 = vmatmul.mubr.f32.vlgmr.msra.gmra.mrb[0].mxu1 %v8148_v44 }
 0x50f   : > { %8570 = vmatpush1.msra.mxu1 %v8569_v8  ;;  %8633 = vmatprep.mubr.f32.mxu1 %v9476_v0 }
 0x510   : > { %8650 = vmatprep.subr.mxu1 %v8649_v21 }
 0x516   : > { %8639 = vmatmul.mubr.f32.vlgmr.msra.gmra.mrb[0].mxu1 %v8638_v9 }
 0x517   : > { %8656 = vmatpush1.msra.mxu1 %v8655_v22  ;;  %8719 = vmatprep.mubr.f32.mxu1 %v9476_v0 }
 0x518   : > { %8729 = vmatprep.subr.mxu1 %v8646_v3 }
 0x51e   : > { %8721 = vmatmul.mubr.f32.vlgmr.msra.gmra.mrb[0].mxu1 %v8634_v6 }
 0x51f   : > { %8732 = vmatpush1.msra.mxu1 %v8652_v13  ;;  %8795 = vmatprep.mubr.f32.mxu1 %v9476_v0 }
 0x520   : > { %8805 = vmatprep.subr.mxu1 %v8567_v63 }
 0x526   : > { %8798 = vmatmul.mubr.f32.vlgmr.msra.gmra.mrb[0].mxu1 %v8635_v16 }
 0x527   : > { %8807 = vmatpush1.msra.mxu1 %v8569_v8  ;;  %8870 = vmatprep.mubr.f32.mxu1 %v9476_v0 }
 0x528   : > { %8883 = vmatprep.subr.mxu1 %v8647_v11 }
 0x52e   : > { %8874 = vmatmul.mubr.f32.vlgmr.msra.gmra.mrb[0].mxu1 %v8636_v19 }
 0x52f   : > { %8887 = vmatpush1.msra.mxu1 %v8653_v20  ;;  %8950 = vmatprep.mubr.f32.mxu1 %v9476_v0 }
 0x530   : > { %8959 = vmatprep.subr.mxu1 %v8567_v63 }
 0x536   : > { %8952 = vmatmul.mubr.f32.vlgmr.msra.gmra.mrb[0].mxu1 %v8634_v6 }
 0x537   : > { %8961 = vmatpush1.msra.mxu1 %v8569_v8  ;;  %9024 = vmatprep.mubr.f32.mxu1 %v9476_v0 }
 0x53e   : > { %9026 = vmatmul.mubr.f32.vlgmr.msra.gmra.mrb[0].mxu1 %v8634_v6 }
 0x611   : > { %v9027_v24 = vpop.f32.mrb[0].mxu1 }
 0x612   : > { %v9147_v25 = vadd.f32 %v9027_v24, %v4667_v23  ;;  %v9029_v26 = vpop.f32.mrb[1].mxu1 }
 0x613   : > { %v9148_v15 = vadd.f32 %v9029_v26, %v4667_v23 }
 0x614   : > { %v9034_v1 = vmax.f32 %v9147_v25, 0.0 }
 0x615   : > { %v9035_v28 = vmax.f32 %v9148_v15, 0.0 }
 0x617   : > { %v9038_v30 = vcombine.low %v9034_v1, %v9035_v28 }
 0x619   : > { %9040 = vst [vmem:[%s217_s9] sm:$0xff] %v9038_v30 }
 0x61a   : > { %9425 = shalt.err (!%p9422_p3)
}
 0x61b   : > { %s9426_s10 = scalar_lea.hbm %s10196_s8, 128  ;;  %s9430_s13 = scalar_lea.hbm %s10243_s5, 256 }
 0x61c   : > { %p9427_p4 = scmp.ne.s32.totalorder %s10196_s8, %s9426_s10  ;;  %p9431_p9 = scmp.lt.u32.totalorder %s10196_s8, %s10243_s5 }
 0x61d   : > { %p9432_p10 = scmp.lt.u32.totalorder %s9430_s13, %s9426_s10  ;;  %p9434_p12 = scmp.lt.u32.totalorder %s9426_s10, %s10196_s8 }
 0x61e   : > { %p9428_p7 = pnand %p9427_p4, %p9555_p5 }
 0x61f   : > { %p9433_p11 = por %p9432_p10, %p9431_p9 }
 0x620   : > { %p9429_p8 = pneg %p9428_p7 }
 0x621   : > { %p9435_p13 = por %p9434_p12, %p9433_p11 }
 0x623   : > { %p9436_p0 = pnand %p9435_p13, %p9429_p8 }
 0x625   : > { %9439 = shalt.err (!%p9436_p0)
}
 0x626   : > { %9361 = dma.vmem_to_hbm [thread:$0]  (%p9555_p5), %s10198_s26, 128, %s10196_s8, %s9042_s14  }
 0x627 PF: > { %p9367_p1 = scmp.ge.s32.totalorder %s9474_s21, 2  ;;  %s9068_s6 = sand.u32 1, %s9462_s18  }
 0x628   : > { %s9069_s9 = scalar_lea.sflag [#allocation3], %s9068_s6 }
 0x629   : > { %p9364_p2 = pnand %p9367_p1, %p9559_p6 }
 0x62b   : > { %9457 = dma.done.wait (!%p9364_p2), %s9069_s9, 128  }
 0x62c   : > { %9459 = vsyncadd (!%p9364_p2), %s9069_s9, 4294967168  ;;  %p15_p3 = scmp.ge.s32.totalorder %s9542_s24, 4   ;;  %s10288_s18 = smov %s9466_s19 }
 0x62d   : > { %s10289_s19 = smov %s9470_s20  ;;  %s10290_s20 = smov %s9553_s27 }
 0x62e   : > { %s10291_s21 = smov %s9542_s24  ;;  %17 = sbr.rel (!%p15_p3) target bundleno = 3 (0x3), region = 91 }
 0x635   :  { %9074 = vsyncpa [#allocation3], 1 }
 0x636   :  { %9076 = vsyncpa [#allocation3 + $0x1], 1 }

</bundles_post_ra>
